<compile_context>
chip_gen: v5e
topology: v5e:2x2
jax: 0.10.0
libtpu: 0.0.40
codegen_flags: <defaults>
</compile_context>

<pallas_src>
import functools
import inspect

import jax
import jax.numpy as jnp
from jax.experimental import pallas as pl
from jax.experimental.pallas import tpu as pltpu


def _layer_norm(x, gamma, beta, eps=1e-5):
    # LayerNorm computed in float32 (matches the LayerNorm subclass in the module).
    x32 = x.astype(jnp.float32)
    mu = jnp.mean(x32, axis=-1, keepdims=True)
    var = jnp.mean((x32 - mu) ** 2, axis=-1, keepdims=True)
    y = (x32 - mu) * jax.lax.rsqrt(var + eps)
    return y * gamma + beta


def residual_attention_kernel(n_head, mlp_chunk,
                              x_ref, mask_ref,
                              ln1g_ref, ln1b_ref,
                              wqkv_ref, bqkv_ref,
                              wout_ref, bout_ref,
                              ln2g_ref, ln2b_ref,
                              wfc_ref, bfc_ref,
                              wproj_ref, bproj_ref,
                              o_ref,
                              ctx_ref):
    x = x_ref[...]                                   # (B, L, D) f32, B = batch_tile
    B, L, D = x.shape
    H = n_head
    hd = D // H
    BL = B * L

    # ---------------- attention branch ----------------
    xn = _layer_norm(x, ln1g_ref[...], ln1b_ref[...])            # (B, L, D) f32
    xn_flat = xn.reshape(BL, D).astype(jnp.bfloat16)
    # one fused QKV matmul; 1/sqrt(hd) already folded into the Q columns of w_qkv
    qkv = jnp.dot(xn_flat, wqkv_ref[...],
                  preferred_element_type=jnp.float32) + bqkv_ref[...]   # (BL, 3D) f32

    # additive key-padding mask, broadcast over query rows (and heads)
    neg = jnp.where(mask_ref[...] > 0.5, -1e9, 0.0)              # (B, 1, L) f32

    for h in range(H):                                           # small static unroll over heads
        qh = qkv[:, h * hd:(h + 1) * hd].reshape(B, L, hd).astype(jnp.bfloat16)
        kh = qkv[:, D + h * hd:D + (h + 1) * hd].reshape(B, L, hd).astype(jnp.bfloat16)
        vh = qkv[:, 2 * D + h * hd:2 * D + (h + 1) * hd].reshape(B, L, hd).astype(jnp.bfloat16)

        # batched over the batch tile: (B, L, hd) x (B, L, hd) -> (B, L, L)
        s = jnp.einsum("bqd,bkd->bqk", qh, kh,
                       preferred_element_type=jnp.float32) + neg
        s = s - jnp.max(s, axis=-1, keepdims=True)
        p = jnp.exp(s)
        p = p * pl.reciprocal(jnp.sum(p, axis=-1, keepdims=True), approx=True)

        ctx_h = jnp.einsum("bqk,bkd->bqd", p.astype(jnp.bfloat16), vh,
                           preferred_element_type=jnp.float32)   # (B, L, hd)
        # write this head's context straight into the scratch slab (no concatenate)
        ctx_ref[:, h * hd:(h + 1) * hd] = ctx_h.reshape(BL, hd).astype(jnp.bfloat16)

    attn_out = jnp.dot(ctx_ref[...], wout_ref[...],
                       preferred_element_type=jnp.float32) + bout_ref[...]   # (BL, D)
    x = x + attn_out.reshape(B, L, D)

    # ---------------- MLP branch (hidden dim in chunks) ----------------
    xn2 = _layer_norm(x, ln2g_ref[...], ln2b_ref[...])
    xn2_flat = xn2.reshape(BL, D).astype(jnp.bfloat16)
    DH = wfc_ref.shape[1]                                        # 4 * D
    mlp = jnp.zeros((BL, D), jnp.float32)
    for c0 in range(0, DH, mlp_chunk):
        c1 = min(c0 + mlp_chunk, DH)
        h1 = jnp.dot(xn2_flat, wfc_ref[:, c0:c1],
                     preferred_element_type=jnp.float32) + bfc_ref[:, c0:c1]
        h1 = h1 * jax.nn.sigmoid(1.702 * h1)                     # QuickGELU in f32
        mlp = mlp + jnp.dot(h1.astype(jnp.bfloat16), wproj_ref[c0:c1, :],
                            preferred_element_type=jnp.float32)
    x = x + (mlp + bproj_ref[...]).reshape(B, L, D)

    o_ref[...] = x


_BLOCKSPEC_HAS_PIPELINE_MODE = (
    hasattr(pl, "Buffered")
    and "pipeline_mode" in inspect.signature(pl.BlockSpec).parameters
)


def _resident_weight_spec(shape):
    """Grid-invariant (weight) block; single-buffer it if this Pallas supports it."""
    nd = len(shape)
    idx = lambda b, _nd=nd: (0,) * _nd
    if _BLOCKSPEC_HAS_PIPELINE_MODE:
        try:
            return pl.BlockSpec(shape, idx, pipeline_mode=pl.Buffered(1))
        except Exception:
            pass
    return pl.BlockSpec(shape, idx)


def residual_attention_block(x_lnd, padding_mask, params, n_head, batch_tile=4):
    """x_lnd: (L, N, D); padding_mask: (N, L) bool. Returns ((L, N, D), padding_mask)."""
    L, N, D = x_lnd.shape
    assert D % n_head == 0
    hd = D // n_head

    # (L, N, D) -> (N, L, D); residual path kept in f32.
    x = jnp.transpose(x_lnd, (1, 0, 2)).astype(jnp.float32)
    mask = padding_mask.astype(jnp.float32).reshape(N, 1, L)

    # pad the batch so it divides the batch tile
    bt = batch_tile
    n_pad = (-N) % bt
    if n_pad:
        x = jnp.concatenate([x, jnp.zeros((n_pad, L, D), jnp.float32)], axis=0)
        mask = jnp.concatenate([mask, jnp.zeros((n_pad, 1, L), jnp.float32)], axis=0)
    Np = N + n_pad

    # fold the 1/sqrt(hd) attention scale into the Q slice of w_qkv / b_qkv (trace time),
    # and pre-cast the matmul weights to bf16 (biases / LN params stay f32).
    scale = 1.0 / (hd ** 0.5)
    w_qkv = params["w_qkv"].astype(jnp.float32)
    w_qkv = jnp.concatenate([w_qkv[:, :D] * scale, w_qkv[:, D:]], axis=1).astype(jnp.bfloat16)
    b_qkv = params["b_qkv"].astype(jnp.float32)
    b_qkv = jnp.concatenate([b_qkv[:, :D] * scale, b_qkv[:, D:]], axis=1)

    weight_args = [
        params["ln1_g"].astype(jnp.float32), params["ln1_b"].astype(jnp.float32),
        w_qkv, b_qkv,
        params["w_out"].astype(jnp.bfloat16), params["b_out"].astype(jnp.float32),
        params["ln2_g"].astype(jnp.float32), params["ln2_b"].astype(jnp.float32),
        params["w_fc"].astype(jnp.bfloat16), params["b_fc"].astype(jnp.float32),
        params["w_proj"].astype(jnp.bfloat16), params["b_proj"].astype(jnp.float32),
    ]

    mlp_chunk = min(4 * D, 512)

    out = pl.pallas_call(
        functools.partial(residual_attention_kernel, n_head, mlp_chunk),
        out_shape=jax.ShapeDtypeStruct((Np, L, D), jnp.float32),
        grid_spec=pltpu.PrefetchScalarGridSpec(
            num_scalar_prefetch=0,
            grid=(Np // bt,),
            in_specs=[pl.BlockSpec((bt, L, D), lambda b: (b, 0, 0)),
                      pl.BlockSpec((bt, 1, L), lambda b: (b, 0, 0))]
                     + [_resident_weight_spec(a.shape) for a in weight_args],
            out_specs=pl.BlockSpec((bt, L, D), lambda b: (b, 0, 0)),
            scratch_shapes=[pltpu.VMEM((bt * L, D), jnp.bfloat16)],   # per-step ctx slab
        ),
        compiler_params=pltpu.CompilerParams(
            dimension_semantics=("parallel",),
            # explicit VMEM budget; for production D (e.g. 768/1024) size this to
            # bf16 weights + double-buffered (bt, L, D) activation blocks.
            vmem_limit_bytes=64 * 1024 * 1024,
        ),
    )(x, mask, *weight_args)

    y = jnp.transpose(out[:N], (1, 0, 2)).astype(x_lnd.dtype)
    return y, padding_mask


# ---------------- pure-JAX reference (mirrors PyTorch MHA semantics, full f32) ----------------
def reference_block(x_lnd, padding_mask, params, n_head):
    L, N, D = x_lnd.shape
    hd = D // n_head

    def ln(x, g, b, eps=1e-5):
        mu = jnp.mean(x, axis=-1, keepdims=True)
        var = jnp.mean((x - mu) ** 2, axis=-1, keepdims=True)
        return (x - mu) / jnp.sqrt(var + eps) * g + b

    x = x_lnd.astype(jnp.float32)                               # (L, N, D)
    xn = ln(x, params["ln1_g"][0], params["ln1_b"][0])
    qkv = xn @ params["w_qkv"] + params["b_qkv"][0]             # (L, N, 3D)
    q, k, v = jnp.split(qkv, 3, axis=-1)

    def heads(t):  # (L, N, D) -> (N, H, L, hd)
        return jnp.transpose(t.reshape(L, N, n_head, hd), (1, 2, 0, 3))

    qh, kh, vh = heads(q) / jnp.sqrt(hd), heads(k), heads(v)
    s = jnp.einsum("nhqd,nhkd->nhqk", qh, kh)
    kp = padding_mask.astype(jnp.float32)[:, None, None, :]     # (N,1,1,L)
    s = s + jnp.where(kp > 0.5, -1e9, 0.0)
    p = jax.nn.softmax(s, axis=-1)
    ctx = jnp.einsum("nhqk,nhkd->nhqd", p, vh)                  # (N,H,L,hd)
    ctx = jnp.transpose(ctx, (2, 0, 1, 3)).reshape(L, N, D)
    attn_out = ctx @ params["w_out"] + params["b_out"][0]
    x = x + attn_out

    xn2 = ln(x, params["ln2_g"][0], params["ln2_b"][0])
    h1 = xn2 @ params["w_fc"] + params["b_fc"][0]
    h1 = h1 * jax.nn.sigmoid(1.702 * h1)
    x = x + (h1 @ params["w_proj"] + params["b_proj"][0])
    return x, padding_mask


def make_params(key, d_model):
    ks = jax.random.split(key, 8)
    D = d_model
    p = {
        # attention (weights stored pre-transposed so the kernel does x @ W)
        "w_qkv": (jax.random.normal(ks[0], (D, 3 * D), jnp.float32) * 0.02),
        "b_qkv": (jax.random.normal(ks[1], (1, 3 * D), jnp.float32) * 0.02),
        "w_out": (jax.random.normal(ks[2], (D, D), jnp.float32) * 0.02),
        "b_out": (jax.random.normal(ks[3], (1, D), jnp.float32) * 0.02),
        # layer norms
        "ln1_g": jnp.ones((1, D), jnp.float32),
        "ln1_b": jnp.zeros((1, D), jnp.float32),
        "ln2_g": jnp.ones((1, D), jnp.float32),
        "ln2_b": jnp.zeros((1, D), jnp.float32),
        # MLP
        "w_fc": (jax.random.normal(ks[4], (D, 4 * D), jnp.float32) * 0.02),
        "b_fc": (jax.random.normal(ks[5], (1, 4 * D), jnp.float32) * 0.02),
        "w_proj": (jax.random.normal(ks[6], (4 * D, D), jnp.float32) * 0.02),
        "b_proj": (jax.random.normal(ks[7], (1, D), jnp.float32) * 0.02),
    }
    return p


if __name__ == "__main__":
    L, N, D, H = 8, 8, 32, 4            # seq, batch, d_model, n_head (small demo shapes)
    key = jax.random.PRNGKey(0)
    k_x, k_p = jax.random.split(key)

    x = jax.random.normal(k_x, (L, N, D), jnp.float32)          # (L, N, D) like PyTorch MHA
    padding_mask = jnp.zeros((N, L), jnp.bool_)
    padding_mask = padding_mask.at[1, L - 2:].set(True)         # pad last 2 keys of batch 1
    padding_mask = padding_mask.at[5, L - 3:].set(True)         # pad last 3 keys of batch 5

    params = make_params(k_p, D)

    y, mask_out = residual_attention_block(x, padding_mask, params, H, batch_tile=4)
    y = jax.block_until_ready(y)

    y_ref, _ = reference_block(x, padding_mask, params, H)
    assert y.shape == (L, N, D)
    # bf16 matmul operands + approx reciprocal => slightly wider tolerance vs f32 reference
    assert jnp.allclose(y, y_ref, atol=1e-2, rtol=1e-2), "mismatch vs reference"

    print("KERNEL_OK")
</pallas_src>

<mosaic_0001>
module attributes {stable_mosaic.version = 11 : i64} {
  func.func @residual_attention_kernel(%arg0: i32, %arg1: memref<4x8x32xf32, #tpu.memory_space<vmem>>, %arg2: memref<4x1x8xf32, #tpu.memory_space<vmem>>, %arg3: memref<1x32xf32, #tpu.memory_space<vmem>>, %arg4: memref<1x32xf32, #tpu.memory_space<vmem>>, %arg5: memref<32x96xbf16, #tpu.memory_space<vmem>>, %arg6: memref<1x96xf32, #tpu.memory_space<vmem>>, %arg7: memref<32x32xbf16, #tpu.memory_space<vmem>>, %arg8: memref<1x32xf32, #tpu.memory_space<vmem>>, %arg9: memref<1x32xf32, #tpu.memory_space<vmem>>, %arg10: memref<1x32xf32, #tpu.memory_space<vmem>>, %arg11: memref<32x128xbf16, #tpu.memory_space<vmem>>, %arg12: memref<1x128xf32, #tpu.memory_space<vmem>>, %arg13: memref<128x32xbf16, #tpu.memory_space<vmem>>, %arg14: memref<1x32xf32, #tpu.memory_space<vmem>>, %arg15: memref<4x8x32xf32, #tpu.memory_space<vmem>>, %arg16: memref<32x32xbf16, #tpu.memory_space<vmem>>) attributes {dimension_semantics = [#tpu.dimension_semantics<parallel>], iteration_bounds = array<i64: 2>, scalar_prefetch = 0 : i64, scratch_operands = 1 : i64, tpu.core_type = #tpu.core_type<tc>, window_params = [{transform_indices = @transform_0, window_bounds = array<i64: 4, 8, 32>}, {transform_indices = @transform_1, window_bounds = array<i64: 4, 1, 8>}, {pipeline_mode = #tpu.pipeline_mode<synchronous>, transform_indices = @transform_2, window_bounds = array<i64: 1, 32>}, {pipeline_mode = #tpu.pipeline_mode<synchronous>, transform_indices = @transform_3, window_bounds = array<i64: 1, 32>}, {pipeline_mode = #tpu.pipeline_mode<synchronous>, transform_indices = @transform_4, window_bounds = array<i64: 32, 96>}, {pipeline_mode = #tpu.pipeline_mode<synchronous>, transform_indices = @transform_5, window_bounds = array<i64: 1, 96>}, {pipeline_mode = #tpu.pipeline_mode<synchronous>, transform_indices = @transform_6, window_bounds = array<i64: 32, 32>}, {pipeline_mode = #tpu.pipeline_mode<synchronous>, transform_indices = @transform_7, window_bounds = array<i64: 1, 32>}, {pipeline_mode = #tpu.pipeline_mode<synchronous>, transform_indices = @transform_8, window_bounds = array<i64: 1, 32>}, {pipeline_mode = #tpu.pipeline_mode<synchronous>, transform_indices = @transform_9, window_bounds = array<i64: 1, 32>}, {pipeline_mode = #tpu.pipeline_mode<synchronous>, transform_indices = @transform_10, window_bounds = array<i64: 32, 128>}, {pipeline_mode = #tpu.pipeline_mode<synchronous>, transform_indices = @transform_11, window_bounds = array<i64: 1, 128>}, {pipeline_mode = #tpu.pipeline_mode<synchronous>, transform_indices = @transform_12, window_bounds = array<i64: 128, 32>}, {pipeline_mode = #tpu.pipeline_mode<synchronous>, transform_indices = @transform_13, window_bounds = array<i64: 1, 32>}, {transform_indices = @transform_14, window_bounds = array<i64: 4, 8, 32>}]} {
    %c0 = arith.constant 0 : index
    %c0_0 = arith.constant 0 : index
    %c0_1 = arith.constant 0 : index
    %0 = vector.load %arg1[%c0, %c0_0, %c0_1] : memref<4x8x32xf32, #tpu.memory_space<vmem>>, vector<4x8x32xf32>
    %c0_2 = arith.constant 0 : index
    %c0_3 = arith.constant 0 : index
    %1 = vector.load %arg3[%c0_2, %c0_3] : memref<1x32xf32, #tpu.memory_space<vmem>>, vector<1x32xf32>
    %c0_4 = arith.constant 0 : index
    %c0_5 = arith.constant 0 : index
    %2 = vector.load %arg4[%c0_4, %c0_5] : memref<1x32xf32, #tpu.memory_space<vmem>>, vector<1x32xf32>
    %cst = arith.constant dense<0.000000e+00> : vector<4x8xf32>
    %3 = vector.multi_reduction <add>, %0, %cst [2] : vector<4x8x32xf32> to vector<4x8xf32>
    %4 = vector.shape_cast %3 : vector<4x8xf32> to vector<4x8x1xf32>
    %cst_6 = arith.constant 3.200000e+01 : f32
    %5 = vector.broadcast %cst_6 : f32 to vector<4x8x1xf32>
    %6 = arith.divf %4, %5 : vector<4x8x1xf32>
    %7 = vector.broadcast %6 : vector<4x8x1xf32> to vector<4x8x32xf32>
    %8 = arith.subf %0, %7 : vector<4x8x32xf32>
    %9 = arith.mulf %8, %8 : vector<4x8x32xf32>
    %cst_7 = arith.constant dense<0.000000e+00> : vector<4x8xf32>
    %10 = vector.multi_reduction <add>, %9, %cst_7 [2] : vector<4x8x32xf32> to vector<4x8xf32>
    %11 = vector.shape_cast %10 : vector<4x8xf32> to vector<4x8x1xf32>
    %cst_8 = arith.constant 3.200000e+01 : f32
    %12 = vector.broadcast %cst_8 : f32 to vector<4x8x1xf32>
    %13 = arith.divf %11, %12 : vector<4x8x1xf32>
    %14 = vector.broadcast %6 : vector<4x8x1xf32> to vector<4x8x32xf32>
    %15 = arith.subf %0, %14 : vector<4x8x32xf32>
    %cst_9 = arith.constant 9.99999974E-6 : f32
    %16 = vector.broadcast %cst_9 : f32 to vector<4x8x1xf32>
    %17 = arith.addf %13, %16 : vector<4x8x1xf32>
    %18 = math.rsqrt %17 : vector<4x8x1xf32>
    %19 = vector.broadcast %18 : vector<4x8x1xf32> to vector<4x8x32xf32>
    %20 = arith.mulf %15, %19 : vector<4x8x32xf32>
    %21 = vector.shape_cast %1 : vector<1x32xf32> to vector<1x1x32xf32>
    %22 = vector.broadcast %21 : vector<1x1x32xf32> to vector<4x8x32xf32>
    %23 = arith.mulf %20, %22 : vector<4x8x32xf32>
    %24 = vector.shape_cast %2 : vector<1x32xf32> to vector<1x1x32xf32>
    %25 = vector.broadcast %24 : vector<1x1x32xf32> to vector<4x8x32xf32>
    %26 = arith.addf %23, %25 : vector<4x8x32xf32>
    %27 = vector.shape_cast %26 : vector<4x8x32xf32> to vector<32x32xf32>
    %28 = arith.truncf %27 : vector<32x32xf32> to vector<32x32xbf16>
    %c0_10 = arith.constant 0 : index
    %c0_11 = arith.constant 0 : index
    %29 = vector.load %arg5[%c0_10, %c0_11] : memref<32x96xbf16, #tpu.memory_space<vmem>>, vector<32x96xbf16>
    %cst_12 = arith.constant dense<0.000000e+00> : vector<32x96xf32>
    %30 = tpu.matmul %28, %29, %cst_12 {dimension_numbers = #tpu.dot_dimension_numbers<[1], [0], [0], [1], [0, 0, 1, 1], [], []>} : vector<32x32xbf16>, vector<32x96xbf16>, vector<32x96xf32> -> vector<32x96xf32>
    %c0_13 = arith.constant 0 : index
    %c0_14 = arith.constant 0 : index
    %31 = vector.load %arg6[%c0_13, %c0_14] : memref<1x96xf32, #tpu.memory_space<vmem>>, vector<1x96xf32>
    %32 = vector.broadcast %31 : vector<1x96xf32> to vector<32x96xf32>
    %33 = arith.addf %30, %32 : vector<32x96xf32>
    %c0_15 = arith.constant 0 : index
    %c0_16 = arith.constant 0 : index
    %c0_17 = arith.constant 0 : index
    %34 = vector.load %arg2[%c0_15, %c0_16, %c0_17] : memref<4x1x8xf32, #tpu.memory_space<vmem>>, vector<4x1x8xf32>
    %cst_18 = arith.constant 5.000000e-01 : f32
    %35 = vector.broadcast %cst_18 : f32 to vector<4x1x8xf32>
    %36 = arith.cmpf ogt, %34, %35 : vector<4x1x8xf32>
    %cst_19 = arith.constant -1.000000e+09 : f32
    %cst_20 = arith.constant 0.000000e+00 : f32
    %37 = vector.broadcast %cst_19 : f32 to vector<4x1x8xf32>
    %38 = vector.broadcast %cst_20 : f32 to vector<4x1x8xf32>
    %39 = arith.select %36, %37, %38 : vector<4x1x8xi1>, vector<4x1x8xf32>
    %40 = vector.extract_strided_slice %33 {offsets = [0, 0], sizes = [32, 8], strides = [1, 1]} : vector<32x96xf32> to vector<32x8xf32>
    %41 = vector.shape_cast %40 : vector<32x8xf32> to vector<4x8x8xf32>
    %42 = arith.truncf %41 : vector<4x8x8xf32> to vector<4x8x8xbf16>
    %43 = vector.extract_strided_slice %33 {offsets = [0, 32], sizes = [32, 8], strides = [1, 1]} : vector<32x96xf32> to vector<32x8xf32>
    %44 = vector.shape_cast %43 : vector<32x8xf32> to vector<4x8x8xf32>
    %45 = arith.truncf %44 : vector<4x8x8xf32> to vector<4x8x8xbf16>
    %46 = vector.extract_strided_slice %33 {offsets = [0, 64], sizes = [32, 8], strides = [1, 1]} : vector<32x96xf32> to vector<32x8xf32>
    %47 = vector.shape_cast %46 : vector<32x8xf32> to vector<4x8x8xf32>
    %48 = arith.truncf %47 : vector<4x8x8xf32> to vector<4x8x8xbf16>
    "tpu.trace_start"() <{level = 10 : i32, message = "bqd,bkd->bqk"}> : () -> ()
    %cst_21 = arith.constant dense<0.000000e+00> : vector<4x8x8xf32>
    %49 = tpu.matmul %42, %45, %cst_21 {dimension_numbers = #tpu.dot_dimension_numbers<[2], [2], [1], [1], [0, 0, 0, 1, 1, 1], [0], [0]>} : vector<4x8x8xbf16>, vector<4x8x8xbf16>, vector<4x8x8xf32> -> vector<4x8x8xf32>
    "tpu.trace_stop"() : () -> ()
    %50 = vector.broadcast %39 : vector<4x1x8xf32> to vector<4x8x8xf32>
    %51 = arith.addf %49, %50 : vector<4x8x8xf32>
    %cst_22 = arith.constant dense<0xFF800000> : vector<4x8xf32>
    %52 = vector.multi_reduction <maximumf>, %51, %cst_22 [2] : vector<4x8x8xf32> to vector<4x8xf32>
    %53 = vector.shape_cast %52 : vector<4x8xf32> to vector<4x8x1xf32>
    %54 = vector.broadcast %53 : vector<4x8x1xf32> to vector<4x8x8xf32>
    %55 = arith.subf %51, %54 : vector<4x8x8xf32>
    %56 = math.exp %55 : vector<4x8x8xf32>
    %cst_23 = arith.constant dense<0.000000e+00> : vector<4x8xf32>
    %57 = vector.multi_reduction <add>, %56, %cst_23 [2] : vector<4x8x8xf32> to vector<4x8xf32>
    %58 = vector.shape_cast %57 : vector<4x8xf32> to vector<4x8x1xf32>
    %59 = tpu.reciprocal %58 {approx = true} : vector<4x8x1xf32> -> vector<4x8x1xf32>
    %60 = vector.broadcast %59 : vector<4x8x1xf32> to vector<4x8x8xf32>
    %61 = arith.mulf %56, %60 : vector<4x8x8xf32>
    %62 = arith.truncf %61 : vector<4x8x8xf32> to vector<4x8x8xbf16>
    "tpu.trace_start"() <{level = 10 : i32, message = "bqk,bkd->bqd"}> : () -> ()
    %cst_24 = arith.constant dense<0.000000e+00> : vector<4x8x8xf32>
    %63 = tpu.matmul %62, %48, %cst_24 {dimension_numbers = #tpu.dot_dimension_numbers<[2], [1], [1], [2], [0, 0, 0, 1, 1, 2], [0], [0]>} : vector<4x8x8xbf16>, vector<4x8x8xbf16>, vector<4x8x8xf32> -> vector<4x8x8xf32>
    "tpu.trace_stop"() : () -> ()
    %64 = vector.shape_cast %63 : vector<4x8x8xf32> to vector<32x8xf32>
    %65 = arith.truncf %64 : vector<32x8xf32> to vector<32x8xbf16>
    %c0_25 = arith.constant 0 : index
    %c0_26 = arith.constant 0 : index
    %66 = vector.load %arg16[%c0_25, %c0_26] : memref<32x32xbf16, #tpu.memory_space<vmem>>, vector<32x8xbf16>
    tpu.vector_store %arg16[%c0_25, %c0_26], %65 {strides = array<i32>} : memref<32x32xbf16, #tpu.memory_space<vmem>>, vector<32x8xbf16>,
    %67 = vector.extract_strided_slice %33 {offsets = [0, 8], sizes = [32, 8], strides = [1, 1]} : vector<32x96xf32> to vector<32x8xf32>
    %68 = vector.shape_cast %67 : vector<32x8xf32> to vector<4x8x8xf32>
    %69 = arith.truncf %68 : vector<4x8x8xf32> to vector<4x8x8xbf16>
    %70 = vector.extract_strided_slice %33 {offsets = [0, 40], sizes = [32, 8], strides = [1, 1]} : vector<32x96xf32> to vector<32x8xf32>
    %71 = vector.shape_cast %70 : vector<32x8xf32> to vector<4x8x8xf32>
    %72 = arith.truncf %71 : vector<4x8x8xf32> to vector<4x8x8xbf16>
    %73 = vector.extract_strided_slice %33 {offsets = [0, 72], sizes = [32, 8], strides = [1, 1]} : vector<32x96xf32> to vector<32x8xf32>
    %74 = vector.shape_cast %73 : vector<32x8xf32> to vector<4x8x8xf32>
    %75 = arith.truncf %74 : vector<4x8x8xf32> to vector<4x8x8xbf16>
    "tpu.trace_start"() <{level = 10 : i32, message = "bqd,bkd->bqk"}> : () -> ()
    %cst_27 = arith.constant dense<0.000000e+00> : vector<4x8x8xf32>
    %76 = tpu.matmul %69, %72, %cst_27 {dimension_numbers = #tpu.dot_dimension_numbers<[2], [2], [1], [1], [0, 0, 0, 1, 1, 1], [0], [0]>} : vector<4x8x8xbf16>, vector<4x8x8xbf16>, vector<4x8x8xf32> -> vector<4x8x8xf32>
    "tpu.trace_stop"() : () -> ()
    %77 = vector.broadcast %39 : vector<4x1x8xf32> to vector<4x8x8xf32>
    %78 = arith.addf %76, %77 : vector<4x8x8xf32>
    %cst_28 = arith.constant dense<0xFF800000> : vector<4x8xf32>
    %79 = vector.multi_reduction <maximumf>, %78, %cst_28 [2] : vector<4x8x8xf32> to vector<4x8xf32>
    %80 = vector.shape_cast %79 : vector<4x8xf32> to vector<4x8x1xf32>
    %81 = vector.broadcast %80 : vector<4x8x1xf32> to vector<4x8x8xf32>
    %82 = arith.subf %78, %81 : vector<4x8x8xf32>
    %83 = math.exp %82 : vector<4x8x8xf32>
    %cst_29 = arith.constant dense<0.000000e+00> : vector<4x8xf32>
    %84 = vector.multi_reduction <add>, %83, %cst_29 [2] : vector<4x8x8xf32> to vector<4x8xf32>
    %85 = vector.shape_cast %84 : vector<4x8xf32> to vector<4x8x1xf32>
    %86 = tpu.reciprocal %85 {approx = true} : vector<4x8x1xf32> -> vector<4x8x1xf32>
    %87 = vector.broadcast %86 : vector<4x8x1xf32> to vector<4x8x8xf32>
    %88 = arith.mulf %83, %87 : vector<4x8x8xf32>
    %89 = arith.truncf %88 : vector<4x8x8xf32> to vector<4x8x8xbf16>
    "tpu.trace_start"() <{level = 10 : i32, message = "bqk,bkd->bqd"}> : () -> ()
    %cst_30 = arith.constant dense<0.000000e+00> : vector<4x8x8xf32>
    %90 = tpu.matmul %89, %75, %cst_30 {dimension_numbers = #tpu.dot_dimension_numbers<[2], [1], [1], [2], [0, 0, 0, 1, 1, 2], [0], [0]>} : vector<4x8x8xbf16>, vector<4x8x8xbf16>, vector<4x8x8xf32> -> vector<4x8x8xf32>
    "tpu.trace_stop"() : () -> ()
    %91 = vector.shape_cast %90 : vector<4x8x8xf32> to vector<32x8xf32>
    %92 = arith.truncf %91 : vector<32x8xf32> to vector<32x8xbf16>
    %c0_31 = arith.constant 0 : index
    %c8 = arith.constant 8 : index
    %93 = vector.load %arg16[%c0_31, %c8] : memref<32x32xbf16, #tpu.memory_space<vmem>>, vector<32x8xbf16>
    tpu.vector_store %arg16[%c0_31, %c8], %92 {strides = array<i32>} : memref<32x32xbf16, #tpu.memory_space<vmem>>, vector<32x8xbf16>,
    %94 = vector.extract_strided_slice %33 {offsets = [0, 16], sizes = [32, 8], strides = [1, 1]} : vector<32x96xf32> to vector<32x8xf32>
    %95 = vector.shape_cast %94 : vector<32x8xf32> to vector<4x8x8xf32>
    %96 = arith.truncf %95 : vector<4x8x8xf32> to vector<4x8x8xbf16>
    %97 = vector.extract_strided_slice %33 {offsets = [0, 48], sizes = [32, 8], strides = [1, 1]} : vector<32x96xf32> to vector<32x8xf32>
    %98 = vector.shape_cast %97 : vector<32x8xf32> to vector<4x8x8xf32>
    %99 = arith.truncf %98 : vector<4x8x8xf32> to vector<4x8x8xbf16>
    %100 = vector.extract_strided_slice %33 {offsets = [0, 80], sizes = [32, 8], strides = [1, 1]} : vector<32x96xf32> to vector<32x8xf32>
    %101 = vector.shape_cast %100 : vector<32x8xf32> to vector<4x8x8xf32>
    %102 = arith.truncf %101 : vector<4x8x8xf32> to vector<4x8x8xbf16>
    "tpu.trace_start"() <{level = 10 : i32, message = "bqd,bkd->bqk"}> : () -> ()
    %cst_32 = arith.constant dense<0.000000e+00> : vector<4x8x8xf32>
    %103 = tpu.matmul %96, %99, %cst_32 {dimension_numbers = #tpu.dot_dimension_numbers<[2], [2], [1], [1], [0, 0, 0, 1, 1, 1], [0], [0]>} : vector<4x8x8xbf16>, vector<4x8x8xbf16>, vector<4x8x8xf32> -> vector<4x8x8xf32>
    "tpu.trace_stop"() : () -> ()
    %104 = vector.broadcast %39 : vector<4x1x8xf32> to vector<4x8x8xf32>
    %105 = arith.addf %103, %104 : vector<4x8x8xf32>
    %cst_33 = arith.constant dense<0xFF800000> : vector<4x8xf32>
    %106 = vector.multi_reduction <maximumf>, %105, %cst_33 [2] : vector<4x8x8xf32> to vector<4x8xf32>
    %107 = vector.shape_cast %106 : vector<4x8xf32> to vector<4x8x1xf32>
    %108 = vector.broadcast %107 : vector<4x8x1xf32> to vector<4x8x8xf32>
    %109 = arith.subf %105, %108 : vector<4x8x8xf32>
    %110 = math.exp %109 : vector<4x8x8xf32>
    %cst_34 = arith.constant dense<0.000000e+00> : vector<4x8xf32>
    %111 = vector.multi_reduction <add>, %110, %cst_34 [2] : vector<4x8x8xf32> to vector<4x8xf32>
    %112 = vector.shape_cast %111 : vector<4x8xf32> to vector<4x8x1xf32>
    %113 = tpu.reciprocal %112 {approx = true} : vector<4x8x1xf32> -> vector<4x8x1xf32>
    %114 = vector.broadcast %113 : vector<4x8x1xf32> to vector<4x8x8xf32>
    %115 = arith.mulf %110, %114 : vector<4x8x8xf32>
    %116 = arith.truncf %115 : vector<4x8x8xf32> to vector<4x8x8xbf16>
    "tpu.trace_start"() <{level = 10 : i32, message = "bqk,bkd->bqd"}> : () -> ()
    %cst_35 = arith.constant dense<0.000000e+00> : vector<4x8x8xf32>
    %117 = tpu.matmul %116, %102, %cst_35 {dimension_numbers = #tpu.dot_dimension_numbers<[2], [1], [1], [2], [0, 0, 0, 1, 1, 2], [0], [0]>} : vector<4x8x8xbf16>, vector<4x8x8xbf16>, vector<4x8x8xf32> -> vector<4x8x8xf32>
    "tpu.trace_stop"() : () -> ()
    %118 = vector.shape_cast %117 : vector<4x8x8xf32> to vector<32x8xf32>
    %119 = arith.truncf %118 : vector<32x8xf32> to vector<32x8xbf16>
    %c0_36 = arith.constant 0 : index
    %c16 = arith.constant 16 : index
    %120 = vector.load %arg16[%c0_36, %c16] : memref<32x32xbf16, #tpu.memory_space<vmem>>, vector<32x8xbf16>
    tpu.vector_store %arg16[%c0_36, %c16], %119 {strides = array<i32>} : memref<32x32xbf16, #tpu.memory_space<vmem>>, vector<32x8xbf16>,
    %121 = vector.extract_strided_slice %33 {offsets = [0, 24], sizes = [32, 8], strides = [1, 1]} : vector<32x96xf32> to vector<32x8xf32>
    %122 = vector.shape_cast %121 : vector<32x8xf32> to vector<4x8x8xf32>
    %123 = arith.truncf %122 : vector<4x8x8xf32> to vector<4x8x8xbf16>
    %124 = vector.extract_strided_slice %33 {offsets = [0, 56], sizes = [32, 8], strides = [1, 1]} : vector<32x96xf32> to vector<32x8xf32>
    %125 = vector.shape_cast %124 : vector<32x8xf32> to vector<4x8x8xf32>
    %126 = arith.truncf %125 : vector<4x8x8xf32> to vector<4x8x8xbf16>
    %127 = vector.extract_strided_slice %33 {offsets = [0, 88], sizes = [32, 8], strides = [1, 1]} : vector<32x96xf32> to vector<32x8xf32>
    %128 = vector.shape_cast %127 : vector<32x8xf32> to vector<4x8x8xf32>
    %129 = arith.truncf %128 : vector<4x8x8xf32> to vector<4x8x8xbf16>
    "tpu.trace_start"() <{level = 10 : i32, message = "bqd,bkd->bqk"}> : () -> ()
    %cst_37 = arith.constant dense<0.000000e+00> : vector<4x8x8xf32>
    %130 = tpu.matmul %123, %126, %cst_37 {dimension_numbers = #tpu.dot_dimension_numbers<[2], [2], [1], [1], [0, 0, 0, 1, 1, 1], [0], [0]>} : vector<4x8x8xbf16>, vector<4x8x8xbf16>, vector<4x8x8xf32> -> vector<4x8x8xf32>
    "tpu.trace_stop"() : () -> ()
    %131 = vector.broadcast %39 : vector<4x1x8xf32> to vector<4x8x8xf32>
    %132 = arith.addf %130, %131 : vector<4x8x8xf32>
    %cst_38 = arith.constant dense<0xFF800000> : vector<4x8xf32>
    %133 = vector.multi_reduction <maximumf>, %132, %cst_38 [2] : vector<4x8x8xf32> to vector<4x8xf32>
    %134 = vector.shape_cast %133 : vector<4x8xf32> to vector<4x8x1xf32>
    %135 = vector.broadcast %134 : vector<4x8x1xf32> to vector<4x8x8xf32>
    %136 = arith.subf %132, %135 : vector<4x8x8xf32>
    %137 = math.exp %136 : vector<4x8x8xf32>
    %cst_39 = arith.constant dense<0.000000e+00> : vector<4x8xf32>
    %138 = vector.multi_reduction <add>, %137, %cst_39 [2] : vector<4x8x8xf32> to vector<4x8xf32>
    %139 = vector.shape_cast %138 : vector<4x8xf32> to vector<4x8x1xf32>
    %140 = tpu.reciprocal %139 {approx = true} : vector<4x8x1xf32> -> vector<4x8x1xf32>
    %141 = vector.broadcast %140 : vector<4x8x1xf32> to vector<4x8x8xf32>
    %142 = arith.mulf %137, %141 : vector<4x8x8xf32>
    %143 = arith.truncf %142 : vector<4x8x8xf32> to vector<4x8x8xbf16>
    "tpu.trace_start"() <{level = 10 : i32, message = "bqk,bkd->bqd"}> : () -> ()
    %cst_40 = arith.constant dense<0.000000e+00> : vector<4x8x8xf32>
    %144 = tpu.matmul %143, %129, %cst_40 {dimension_numbers = #tpu.dot_dimension_numbers<[2], [1], [1], [2], [0, 0, 0, 1, 1, 2], [0], [0]>} : vector<4x8x8xbf16>, vector<4x8x8xbf16>, vector<4x8x8xf32> -> vector<4x8x8xf32>
    "tpu.trace_stop"() : () -> ()
    %145 = vector.shape_cast %144 : vector<4x8x8xf32> to vector<32x8xf32>
    %146 = arith.truncf %145 : vector<32x8xf32> to vector<32x8xbf16>
    %c0_41 = arith.constant 0 : index
    %c24 = arith.constant 24 : index
    %147 = vector.load %arg16[%c0_41, %c24] : memref<32x32xbf16, #tpu.memory_space<vmem>>, vector<32x8xbf16>
    tpu.vector_store %arg16[%c0_41, %c24], %146 {strides = array<i32>} : memref<32x32xbf16, #tpu.memory_space<vmem>>, vector<32x8xbf16>,
    %c0_42 = arith.constant 0 : index
    %c0_43 = arith.constant 0 : index
    %148 = vector.load %arg16[%c0_42, %c0_43] : memref<32x32xbf16, #tpu.memory_space<vmem>>, vector<32x32xbf16>
    %c0_44 = arith.constant 0 : index
    %c0_45 = arith.constant 0 : index
    %149 = vector.load %arg7[%c0_44, %c0_45] : memref<32x32xbf16, #tpu.memory_space<vmem>>, vector<32x32xbf16>
    %cst_46 = arith.constant dense<0.000000e+00> : vector<32x32xf32>
    %150 = tpu.matmul %148, %149, %cst_46 {dimension_numbers = #tpu.dot_dimension_numbers<[1], [0], [0], [1], [0, 0, 1, 1], [], []>} : vector<32x32xbf16>, vector<32x32xbf16>, vector<32x32xf32> -> vector<32x32xf32>
    %c0_47 = arith.constant 0 : index
    %c0_48 = arith.constant 0 : index
    %151 = vector.load %arg8[%c0_47, %c0_48] : memref<1x32xf32, #tpu.memory_space<vmem>>, vector<1x32xf32>
    %152 = vector.broadcast %151 : vector<1x32xf32> to vector<32x32xf32>
    %153 = arith.addf %150, %152 : vector<32x32xf32>
    %154 = vector.shape_cast %153 : vector<32x32xf32> to vector<4x8x32xf32>
    %155 = arith.addf %0, %154 : vector<4x8x32xf32>
    %c0_49 = arith.constant 0 : index
    %c0_50 = arith.constant 0 : index
    %156 = vector.load %arg9[%c0_49, %c0_50] : memref<1x32xf32, #tpu.memory_space<vmem>>, vector<1x32xf32>
    %c0_51 = arith.constant 0 : index
    %c0_52 = arith.constant 0 : index
    %157 = vector.load %arg10[%c0_51, %c0_52] : memref<1x32xf32, #tpu.memory_space<vmem>>, vector<1x32xf32>
    %cst_53 = arith.constant dense<0.000000e+00> : vector<4x8xf32>
    %158 = vector.multi_reduction <add>, %155, %cst_53 [2] : vector<4x8x32xf32> to vector<4x8xf32>
    %159 = vector.shape_cast %158 : vector<4x8xf32> to vector<4x8x1xf32>
    %cst_54 = arith.constant 3.200000e+01 : f32
    %160 = vector.broadcast %cst_54 : f32 to vector<4x8x1xf32>
    %161 = arith.divf %159, %160 : vector<4x8x1xf32>
    %162 = vector.broadcast %161 : vector<4x8x1xf32> to vector<4x8x32xf32>
    %163 = arith.subf %155, %162 : vector<4x8x32xf32>
    %164 = arith.mulf %163, %163 : vector<4x8x32xf32>
    %cst_55 = arith.constant dense<0.000000e+00> : vector<4x8xf32>
    %165 = vector.multi_reduction <add>, %164, %cst_55 [2] : vector<4x8x32xf32> to vector<4x8xf32>
    %166 = vector.shape_cast %165 : vector<4x8xf32> to vector<4x8x1xf32>
    %cst_56 = arith.constant 3.200000e+01 : f32
    %167 = vector.broadcast %cst_56 : f32 to vector<4x8x1xf32>
    %168 = arith.divf %166, %167 : vector<4x8x1xf32>
    %169 = vector.broadcast %161 : vector<4x8x1xf32> to vector<4x8x32xf32>
    %170 = arith.subf %155, %169 : vector<4x8x32xf32>
    %cst_57 = arith.constant 9.99999974E-6 : f32
    %171 = vector.broadcast %cst_57 : f32 to vector<4x8x1xf32>
    %172 = arith.addf %168, %171 : vector<4x8x1xf32>
    %173 = math.rsqrt %172 : vector<4x8x1xf32>
    %174 = vector.broadcast %173 : vector<4x8x1xf32> to vector<4x8x32xf32>
    %175 = arith.mulf %170, %174 : vector<4x8x32xf32>
    %176 = vector.shape_cast %156 : vector<1x32xf32> to vector<1x1x32xf32>
    %177 = vector.broadcast %176 : vector<1x1x32xf32> to vector<4x8x32xf32>
    %178 = arith.mulf %175, %177 : vector<4x8x32xf32>
    %179 = vector.shape_cast %157 : vector<1x32xf32> to vector<1x1x32xf32>
    %180 = vector.broadcast %179 : vector<1x1x32xf32> to vector<4x8x32xf32>
    %181 = arith.addf %178, %180 : vector<4x8x32xf32>
    %182 = vector.shape_cast %181 : vector<4x8x32xf32> to vector<32x32xf32>
    %183 = arith.truncf %182 : vector<32x32xf32> to vector<32x32xbf16>
    %cst_58 = arith.constant 0.000000e+00 : f32
    %184 = vector.broadcast %cst_58 : f32 to vector<32x32xf32>
    %c0_59 = arith.constant 0 : index
    %c0_60 = arith.constant 0 : index
    %185 = vector.load %arg11[%c0_59, %c0_60] : memref<32x128xbf16, #tpu.memory_space<vmem>>, vector<32x128xbf16>
    %cst_61 = arith.constant dense<0.000000e+00> : vector<32x128xf32>
    %186 = tpu.matmul %183, %185, %cst_61 {dimension_numbers = #tpu.dot_dimension_numbers<[1], [0], [0], [1], [0, 0, 1, 1], [], []>} : vector<32x32xbf16>, vector<32x128xbf16>, vector<32x128xf32> -> vector<32x128xf32>
    %c0_62 = arith.constant 0 : index
    %c0_63 = arith.constant 0 : index
    %187 = vector.load %arg12[%c0_62, %c0_63] : memref<1x128xf32, #tpu.memory_space<vmem>>, vector<1x128xf32>
    %188 = vector.broadcast %187 : vector<1x128xf32> to vector<32x128xf32>
    %189 = arith.addf %186, %188 : vector<32x128xf32>
    %cst_64 = arith.constant 1.702000e+00 : f32
    %190 = vector.broadcast %cst_64 : f32 to vector<32x128xf32>
    %191 = arith.mulf %190, %189 : vector<32x128xf32>
    %192 = arith.negf %191 : vector<32x128xf32>
    %193 = math.exp %192 : vector<32x128xf32>
    %cst_65 = arith.constant 1.000000e+00 : f32
    %194 = vector.broadcast %cst_65 : f32 to vector<32x128xf32>
    %195 = arith.addf %194, %193 : vector<32x128xf32>
    %196 = arith.divf %194, %195 : vector<32x128xf32>
    %197 = arith.mulf %189, %196 : vector<32x128xf32>
    %198 = arith.truncf %197 : vector<32x128xf32> to vector<32x128xbf16>
    %c0_66 = arith.constant 0 : index
    %c0_67 = arith.constant 0 : index
    %199 = vector.load %arg13[%c0_66, %c0_67] : memref<128x32xbf16, #tpu.memory_space<vmem>>, vector<128x32xbf16>
    %cst_68 = arith.constant dense<0.000000e+00> : vector<32x32xf32>
    %200 = tpu.matmul %198, %199, %cst_68 {dimension_numbers = #tpu.dot_dimension_numbers<[1], [0], [0], [1], [0, 0, 1, 1], [], []>} : vector<32x128xbf16>, vector<128x32xbf16>, vector<32x32xf32> -> vector<32x32xf32>
    %201 = arith.addf %184, %200 : vector<32x32xf32>
    %c0_69 = arith.constant 0 : index
    %c0_70 = arith.constant 0 : index
    %202 = vector.load %arg14[%c0_69, %c0_70] : memref<1x32xf32, #tpu.memory_space<vmem>>, vector<1x32xf32>
    %203 = vector.broadcast %202 : vector<1x32xf32> to vector<32x32xf32>
    %204 = arith.addf %201, %203 : vector<32x32xf32>
    %205 = vector.shape_cast %204 : vector<32x32xf32> to vector<4x8x32xf32>
    %206 = arith.addf %155, %205 : vector<4x8x32xf32>
    %c0_71 = arith.constant 0 : index
    %c0_72 = arith.constant 0 : index
    %c0_73 = arith.constant 0 : index
    %207 = vector.load %arg15[%c0_71, %c0_72, %c0_73] : memref<4x8x32xf32, #tpu.memory_space<vmem>>, vector<4x8x32xf32>
    tpu.vector_store %arg15[%c0_71, %c0_72, %c0_73], %206 {strides = array<i32>} : memref<4x8x32xf32, #tpu.memory_space<vmem>>, vector<4x8x32xf32>,
    return
  }
  func.func @transform_0(%arg0: i32) -> (i32, i32, i32) {
    %c0_i32 = arith.constant 0 : i32
    %c0_i32_0 = arith.constant 0 : i32
    %c0_i32_1 = arith.constant 0 : i32
    return %arg0, %c0_i32, %c0_i32_0 : i32, i32, i32
  }
  func.func @transform_1(%arg0: i32) -> (i32, i32, i32) {
    %c0_i32 = arith.constant 0 : i32
    %c0_i32_0 = arith.constant 0 : i32
    %c0_i32_1 = arith.constant 0 : i32
    return %arg0, %c0_i32, %c0_i32_0 : i32, i32, i32
  }
  func.func @transform_2(%arg0: i32) -> (i32, i32) {
    %c0_i32 = arith.constant 0 : i32
    %c0_i32_0 = arith.constant 0 : i32
    %c0_i32_1 = arith.constant 0 : i32
    return %c0_i32, %c0_i32_0 : i32, i32
  }
  func.func @transform_3(%arg0: i32) -> (i32, i32) {
    %c0_i32 = arith.constant 0 : i32
    %c0_i32_0 = arith.constant 0 : i32
    %c0_i32_1 = arith.constant 0 : i32
    return %c0_i32, %c0_i32_0 : i32, i32
  }
  func.func @transform_4(%arg0: i32) -> (i32, i32) {
    %c0_i32 = arith.constant 0 : i32
    %c0_i32_0 = arith.constant 0 : i32
    %c0_i32_1 = arith.constant 0 : i32
    return %c0_i32, %c0_i32_0 : i32, i32
  }
  func.func @transform_5(%arg0: i32) -> (i32, i32) {
    %c0_i32 = arith.constant 0 : i32
    %c0_i32_0 = arith.constant 0 : i32
    %c0_i32_1 = arith.constant 0 : i32
    return %c0_i32, %c0_i32_0 : i32, i32
  }
  func.func @transform_6(%arg0: i32) -> (i32, i32) {
    %c0_i32 = arith.constant 0 : i32
    %c0_i32_0 = arith.constant 0 : i32
    %c0_i32_1 = arith.constant 0 : i32
    return %c0_i32, %c0_i32_0 : i32, i32
  }
  func.func @transform_7(%arg0: i32) -> (i32, i32) {
    %c0_i32 = arith.constant 0 : i32
    %c0_i32_0 = arith.constant 0 : i32
    %c0_i32_1 = arith.constant 0 : i32
    return %c0_i32, %c0_i32_0 : i32, i32
  }
  func.func @transform_8(%arg0: i32) -> (i32, i32) {
    %c0_i32 = arith.constant 0 : i32
    %c0_i32_0 = arith.constant 0 : i32
    %c0_i32_1 = arith.constant 0 : i32
    return %c0_i32, %c0_i32_0 : i32, i32
  }
  func.func @transform_9(%arg0: i32) -> (i32, i32) {
    %c0_i32 = arith.constant 0 : i32
    %c0_i32_0 = arith.constant 0 : i32
    %c0_i32_1 = arith.constant 0 : i32
    return %c0_i32, %c0_i32_0 : i32, i32
  }
  func.func @transform_10(%arg0: i32) -> (i32, i32) {
    %c0_i32 = arith.constant 0 : i32
    %c0_i32_0 = arith.constant 0 : i32
    %c0_i32_1 = arith.constant 0 : i32
    return %c0_i32, %c0_i32_0 : i32, i32
  }
  func.func @transform_11(%arg0: i32) -> (i32, i32) {
    %c0_i32 = arith.constant 0 : i32
    %c0_i32_0 = arith.constant 0 : i32
    %c0_i32_1 = arith.constant 0 : i32
    return %c0_i32, %c0_i32_0 : i32, i32
  }
  func.func @transform_12(%arg0: i32) -> (i32, i32) {
    %c0_i32 = arith.constant 0 : i32
    %c0_i32_0 = arith.constant 0 : i32
    %c0_i32_1 = arith.constant 0 : i32
    return %c0_i32, %c0_i32_0 : i32, i32
  }
  func.func @transform_13(%arg0: i32) -> (i32, i32) {
    %c0_i32 = arith.constant 0 : i32
    %c0_i32_0 = arith.constant 0 : i32
    %c0_i32_1 = arith.constant 0 : i32
    return %c0_i32, %c0_i32_0 : i32, i32
  }
  func.func @transform_14(%arg0: i32) -> (i32, i32, i32) {
    %c0_i32 = arith.constant 0 : i32
    %c0_i32_0 = arith.constant 0 : i32
    %c0_i32_1 = arith.constant 0 : i32
    return %arg0, %c0_i32, %c0_i32_0 : i32, i32, i32
  }
}

</mosaic_0001>

<bundles_post_ra>
// kernel: tpu_custom_call.1
= control target key start
LH: loop header
LB: loop body
LE: loop exit
PB: predicated region body
PF: predicated region fallthrough
CT: control target
= control target key end

     0   :  { %s3394_s0 = inlined_call_operand.vmem [shape: f32[8,8,32], index: 0, kind: input, shape index: {}]   ;;  %s3395_s1 = inlined_call_operand.hbm [shape: f32[8,1,8], index: 1, kind: input, shape index: {}]   ;;  %s3396_s2 = inlined_call_operand.vmem [shape: f32[1,32], index: 2, kind: input, shape index: {}]   ;;  %s3397_s3 = inlined_call_operand.vmem [shape: f32[1,32], index: 3, kind: input, shape index: {}]   ;;  %s3398_s4 = inlined_call_operand.vmem [shape: bf16[32,96], index: 4, kind: input, shape index: {}]   ;;  %s3399_s5 = inlined_call_operand.vmem [shape: f32[1,96], index: 5, kind: input, shape index: {}]   ;;  %s3400_s6 = inlined_call_operand.hbm [shape: bf16[32,32], index: 6, kind: input, shape index: {}]   ;;  %s3401_s7 = inlined_call_operand.vmem [shape: f32[1,32], index: 7, kind: input, shape index: {}]   ;;  %s3402_s8 = inlined_call_operand.vmem [shape: f32[1,32], index: 8, kind: input, shape index: {}]   ;;  %s3403_s9 = inlined_call_operand.vmem [shape: f32[1,32], index: 9, kind: input, shape index: {}]   ;;  %s3404_s10 = inlined_call_operand.hbm [shape: bf16[32,128], index: 10, kind: input, shape index: {}]   ;;  %s3405_s11 = inlined_call_operand.vmem [shape: f32[1,128], index: 11, kind: input, shape index: {}]   ;;  %s3406_s12 = inlined_call_operand.vmem [shape: bf16[128,32], index: 12, kind: input, shape index: {}]   ;;  %s3407_s13 = inlined_call_operand.vmem [shape: f32[1,32], index: 13, kind: input, shape index: {}]   ;;  %s3408_s14 = inlined_call_operand.hbm [shape: f32[8,8,32], index: 14, kind: output, shape index: {}]  }
   0x1   :  { %3415 = sst [smem:[#allocation18_spill]] %s3400_s6 }
   0x2   :  { %3416 = sst [smem:[#allocation19_spill]] %s3404_s10 }
   0x3   :  { %3417 = sst [smem:[#allocation20_spill]] %s3408_s14 }
   0x4   :  { %19 = vsyncpa [#allocation4], 0 }
   0x5   :  { %21 = vsyncpa [#allocation4 + $0x1], 0 }
   0x6   :  { %22 = vsyncpa [#allocation7], 0 }
   0x7   :  { %23 = vsyncpa [#allocation5], 0 }
   0x8   :  { %25 = vsyncpa [#allocation5 + $0x1], 0  ;;  %s2837_s29 = smov 0   ;;  %s2839_s30 = smov 0  }
   0x9   :  { %s2841_s15 = smov 0   ;;  %s2843_s16 = smov 0  }
   0xa LB: > { %3418 = sst [smem:[#allocation13_spill]] %s2725_s29  ;;  %s2858_s17 = sadd.s32 4294967295, %s2737_s16   ;;  %s2737_s16 = sphi %s2843_s16, %s3434_s16   ;;  %s2733_s15 = sphi %s2841_s15, %s3436_s15   ;;  %s2729_s30 = sphi %s2839_s30, %s3438_s30   ;;  %s2725_s29 = sphi %s2837_s29, %s3437_s29  }
   0xb   : > { %3419 = sst [smem:[#allocation14_spill]] %s2733_s15  ;;  %s2237_s18 = sadd.s32 4294967294, %s2737_s16  }
   0xc   : > { %p77_p0 = scmp.ne.s32.totalorder %s2729_s30, %s2725_s29  ;;  %p78_p1 = scmp.eq.s32.totalorder %s2858_s17, 0 }
   0xd   : > { %p353_p2 = scmp.eq.s32.totalorder %s2858_s17, 1  ;;  %p359_p3 = scmp.eq.s32.totalorder %s2237_s18, 1 }
   0xe   : > { %p2867_p4 = por %p78_p1, %p77_p0  ;;  %p2238_p5 = scmp.ge.s32.totalorder %s2737_s16, 1 }
   0xf   : > { %p2872_p6 = por %p359_p3, %p77_p0  ;;  %p366_p7 = scmp.lt.s32.totalorder %s2737_s16, 3 }
  0x10   : > { %s3423_s6 = sld [smem:[#allocation18_spill]]  ;;  %s2739_s25 = smov [#allocation6]  }
  0x11   : > { %s3421_s20 = scalar_select %p2872_p6, 1, 0 }
  0x12   : > { %p2880_p8 = pnand %p2238_p5, %p366_p7  ;;  %s391_s26 = sshll.u32 %s2739_s25, 4  ;;  %s392_s26 = int_to_ptr.vmem [resolvable:$true] %s391_s26 }
  0x13   : > { %3422 = sst [smem:[#allocation15_spill]] %s3421_s20  ;;  %s2740_s21 = smov 64  }
  0x14   : > { %p2391_p9 = pneg %p2880_p8  ;;  %s3425_s10 = sld [smem:[#allocation19_spill]] }
  0x15   : > { %s2741_s22 = smov 4   ;;  %s2742_s25 = smov [#allocation8]  }
  0x16   : > { %s389_s23 = sshll.u32 %s3423_s6, 4  ;;  %p2392_p10 = pnand %p2391_p9, %p78_p1  ;;  %s390_s23 = int_to_ptr.hbm [resolvable:$true] %s389_s23 }
  0x17   : > { %s414_s6 = sshll.u32 %s2742_s25, 4  ;;  %s2893_s20 = sadd.s32 1, %s2737_s16   ;;  %s415_s6 = int_to_ptr.vmem [resolvable:$true] %s414_s6 }
  0x18   : > { %2394 = dma.hbm_to_vmem [thread:$0]  (!%p2392_p10), %s390_s23, 256, %s392_s26, [#allocation7], %s2740_s21, %s2740_s21, %s2741_s22  }
  0x19   : > { %3426 = sst [smem:[#allocation16_spill]] %s2893_s20  ;;  %s64_s29 = sadd.s32 1, %s2733_s15 }
  0x1a   : > { %s412_s18 = sshll.u32 %s3425_s10, 4  ;;  %s61_s14 = ssub.s32 %s2737_s16, %s2893_s20  ;;  %s413_s18 = int_to_ptr.hbm [resolvable:$true] %s412_s18 }
  0x1b   : > { %2397 = dma.hbm_to_vmem [thread:$0]  (!%p2392_p10), %s413_s18, 256, %s415_s6, [#allocation7], %s2740_s21, %s2740_s21, %s2741_s22  }
  0x1c   : > { %p71_p12 = scmp.ne.s32.totalorder %s2733_s15, %s2729_s30  ;;  %p62_p13 = scmp.eq.s32.totalorder %s61_s14, 0 }
  0x1d   : > { %p72_p0 = scmp.eq.s32.totalorder %s2737_s16, 0  ;;  %p2408_p5 = scmp.lt.s32.totalorder %s2737_s16, 2 }
  0x1e   : > { %p2903_p3 = por %p353_p2, %p71_p12  ;;  %s446_s26 = sand.u32 1, %s2733_s15  }
  0x1f   : > { %s2909_s23 = scalar_select %p62_p13, %s2733_s15, %s64_s29  }
  0x20   : > { %p73_p7 = por %p72_p0, %p71_p12  ;;  %s2242_s28 = sshll.u32 %s446_s26, 2 }
  0x21   : > { %3428 = sst [smem:[#allocation17_spill]] %s2909_s23  ;;  %s2243_s6 = sshll.u32 %s2737_s16, 2 }
  0x22   : > { %s454_s22 = scalar_lea.hbm %s3395_s1, %s2243_s6  ;;  %s450_s25 = scalar_lea.vmem [#allocation3], %s2242_s28 }
  0x23   : > { %s457_s10 = sshll.u32 %s450_s25, 4  ;;  %s455_s14 = sshll.u32 %s454_s22, 4  ;;  %s458_s10 = int_to_ptr.vmem [resolvable:$true] %s457_s10  ;;  %s456_s14 = int_to_ptr.hbm [resolvable:$true] %s455_s14 }
  0x24   : > { %p2916_p2 = pnand %p2408_p5, %p73_p7  ;;  %s447_s29 = scalar_lea.sflag [#allocation4], %s446_s26 }
  0x25   : > { %s2637_s23 = sshra.s32 %s456_s14, 4  ;;  %s2644_s18 = scalar_lea.hbm %s3395_s1, 8  ;;  %s2638_s23 = int_to_ptr.hbm [resolvable:$true] %s2637_s23 }
  0x26   : > { %s2639_s15 = scalar_lea.hbm %s2638_s23, 4  ;;  %p2641_p10 = pneg %p2916_p2 }
  0x27   : > { %p2640_p9 = scmp.ne.s32.totalorder %s2638_s23, %s2639_s15  ;;  %p2645_p0 = scmp.lt.s32.totalorder %s2638_s23, %s3395_s1 }
  0x28   : > { %p2646_p5 = scmp.lt.s32.totalorder %s2644_s18, %s2639_s15 }
  0x29   : > { %p2642_p12 = pnand %p2641_p10, %p2640_p9 }
  0x2a   : > { %p2647_p7 = por %p2646_p5, %p2645_p0 }
  0x2b   : > { %p2643_p13 = pneg %p2642_p12 }
  0x2d   : > { %p2648_p11 = pnand %p2647_p7, %p2643_p13 }
  0x2f   : > { %2651 = shalt.err (!%p2648_p11)
}
  0x30   : > { %s2743_s26 = smov 16   ;;  %s2744_s25 = smov 1  }
  0x31   : > { %2401 = dma.hbm_to_vmem [thread:$0]  (!%p2916_p2), %s456_s14, 64, %s458_s10, %s447_s29, %s2743_s26, %s2743_s26, %s2744_s25  }
  0x32   : > { %469 = sbr.rel (%p2880_p8) target bundleno = 3272 (0xcc8), region = 76  ;;  %s2933_s6 = sand.u32 (!%p2880_p8), 1, %s2729_s30  }
  0x33   : > { %s2245_s28 = sshll.u32 (!%p2880_p8), %s2933_s6, 2  ;;  %s472_s23 = scalar_lea.sflag (!%p2880_p8), [#allocation4], %s2933_s6 }
  0x34   : > { %s2937_s15 = scalar_lea.vmem (!%p2880_p8), [#allocation3], %s2245_s28 }
  0x37   : > { %2712 = dma.done.wait (%p2867_p4), %s472_s23, 64  }
  0x38   : > { %2714 = vsyncadd (%p2867_p4), %s472_s23, 4294967232 }
  0x39   : > { %2716 = dma.done.wait (%p78_p1), [#allocation7], 512  }
  0x3a   : > { %2718 = vsyncadd (%p78_p1), [#allocation7], 4294966784  ;;  %s2249_s10 = sshll.u32 %s2858_s17, 2  ;;  %vm551_vm0 = vcmask 261120   ;;  %v2745_v8 = vmov 32.0   ;;  %v2363_v35 = vld [vmem:[%s3398_s4 + $0x8] sm:$0xff] }
  0x3b   : > { %p537_p8 = scmp.lt.s32.totalorder %s2249_s10, 7  ;;  %2475 = vrcp.f32 %v2745_v8  ;;  %695 = vmatpush.bf16.msra.mxu1 %v2363_v35  ;;  %v2362_v39 = vld [vmem:[%s3398_s4] sm:$0xff]  ;;  %s2746_s24 = smov 96   ;;  %vm741_vm14 = vcmask 64512  }
  0x3c   : > { %s2748_s14 = smov 64   ;;  %s2749_s19 = smov 88  }
  0x3d   : > { %s3440_s10 = smov (!%p537_p8, %s2249_s10), 7  ;;  %s2750_s18 = smov 120  }
  0x3e   : > { %s2250_s20 = sshll.u32 %s3440_s10, 3  ;;  %s2752_s21 = smov 80  }
  0x3f   : > { %s2951_s29 = scalar_lea.vmem %s3394_s0, %s2250_s20  ;;  %696 = vmatpush.bf16.msra.mxu1 %v2362_v39  ;;  %s2753_s22 = smov 112  }
  0x40   : > { %v547_v0 = vld [vmem:[%s2951_s29 + $0x10] sm:$0xff]  ;;  %v545_v1 = vld [vmem:[%s2951_s29] sm:$0xff]  ;;  %v548_v4 = vld [vmem:[%s2951_s29 + $0x18] sm:$0xff]  ;;  %s2754_s26 = smov 48   ;;  %s2755_s25 = smov 72  }
  0x41   : > { %v558_v2 = vsel %vm551_vm0, %v547_v0, 0.0  ;;  %v552_v3 = vsel %vm551_vm0, %v545_v1, 0.0  ;;  %v546_v5 = vld [vmem:[%s2951_s29 + $0x8] sm:$0xff]  ;;  %v561_v6 = vsel %vm551_vm0, %v548_v4, 0.0  ;;  %v2476_v9 = vpop.eup %2475  ;;  %s2756_s28 = smov 104   ;;  %s2757_s23 = smov 40  }
  0x42   : > { %559 = vadd.xlane.f32.xlu1 %v558_v2  ;;  %553 = vadd.xlane.f32.xlu0 %v552_v3  ;;  %v555_v7 = vsel %vm551_vm0, %v546_v5, 0.0  ;;  %v565_v10 = vmul.f32 32.0, %v2476_v9  ;;  %vm569_vm1 = vweird.f32 %v2476_v9  ;;  %s2758_s10 = smov 8   ;;  %s2759_s20 = smov 16  }
  0x44   : > { %v566_v11 = vsub.f32 1.0, %v565_v10 }
  0x46   : > { %v567_v12 = vmul.f32 %v2476_v9, %v566_v11 }
  0x48   : > { %v568_v13 = vadd.f32 %v2476_v9, %v567_v12  ;;  %v2468_v12 = vld [vmem:[%s3397_s3] ss:$0 sm:$0xff] }
  0x4a   : > { %562 = vadd.xlane.f32.xlu1 %v561_v6  ;;  %556 = vadd.xlane.f32.xlu0 %v555_v7  ;;  %v2961_v14 = vsel %vm569_vm1, %v2476_v9, %v568_v13 }
  0xb5   : > { %v560_v15 = vpop.xlane.xlu1 %559  ;;  %v554_v16 = vpop.xlane.xlu0 %553 }
  0xb6   : > { %v573_v17 = vmul.f32 %v2961_v14, %v560_v15  ;;  %v571_v18 = vmul.f32 %v2961_v14, %v554_v16 }
  0xb8   : > { %v2965_v19 = vsub.f32 %v547_v0, %v573_v17  ;;  %v575_v20 = vsub.f32 %v545_v1, %v571_v18 }
  0xba   : > { %v581_v21 = vmul.f32 %v2965_v19, %v2965_v19  ;;  %v579_v22 = vmul.f32 %v575_v20, %v575_v20 }
  0xbc   : > { %v589_v23 = vsel %vm551_vm0, %v581_v21, 0.0  ;;  %v583_v24 = vsel %vm551_vm0, %v579_v22, 0.0 }
  0xbd   : > { %v563_v25 = vpop.xlane.xlu1 %562  ;;  %590 = vadd.xlane.f32.xlu0 %v589_v23  ;;  %584 = vadd.xlane.f32.xlu2 %v583_v24  ;;  %v557_v26 = vpop.xlane.xlu0 %556 }
  0xbe   : > { %v574_v27 = vmul.f32 %v2961_v14, %v563_v25  ;;  %v572_v28 = vmul.f32 %v2961_v14, %v557_v26 }
  0xc0   : > { %v2973_v29 = vsub.f32 %v548_v4, %v574_v27  ;;  %v576_v30 = vsub.f32 %v546_v5, %v572_v28  ;;  %v2467_v5 = vld [vmem:[%s3396_s2] ss:$0 sm:$0xff] }
  0xc2   : > { %v582_v31 = vmul.f32 %v2973_v29, %v2973_v29  ;;  %v580_v32 = vmul.f32 %v576_v30, %v576_v30 }
  0xc4   : > { %v592_v33 = vsel %vm551_vm0, %v582_v31, 0.0  ;;  %v586_v34 = vsel %vm551_vm0, %v580_v32, 0.0  ;;  %v2469_v32 = vld [vmem:[%s3399_s5] ss:$0 sm:$0xff] }
  0xc5   : > { %593 = vadd.xlane.f32.xlu1 %v592_v33  ;;  %587 = vadd.xlane.f32.xlu2 %v586_v34 }
 0x130   : > { %v585_v36 = vpop.xlane.xlu2 %584  ;;  %v591_v38 = vpop.xlane.xlu0 %590 }
 0x131   : > { %v595_v37 = vmul.f32 %v585_v36, %v2961_v14  ;;  %v597_v41 = vmul.f32 %v591_v38, %v2961_v14 }
 0x133   : > { %v599_v40 = vadd.f32 1e-05, %v595_v37  ;;  %v601_v42 = vadd.f32 1e-05, %v597_v41 }
 0x135   : > { %2477 = vrsqrt.f32 %v599_v40  ;;  %vm609_vm3 = vweird.f32 %v599_v40  ;;  %vm629_vm10 = vweird.f32 %v601_v42 }
 0x136   : > { %2479 = vrsqrt.f32 %v601_v42 }
 0x138   : > { %v594_v43 = vpop.xlane.xlu1 %593  ;;  %v588_v44 = vpop.xlane.xlu2 %587 }
 0x139   : > { %v598_v45 = vmul.f32 %v594_v43, %v2961_v14  ;;  %v596_v46 = vmul.f32 %v588_v44, %v2961_v14 }
 0x13b   : > { %v2478_v47 = vpop.eup %2477  ;;  %v602_v48 = vadd.f32 1e-05, %v598_v45  ;;  %v600_v49 = vadd.f32 1e-05, %v596_v46 }
 0x13c   : > { %v604_v50 = vmul.f32 %v2478_v47, %v599_v40  ;;  %v2480_v53 = vpop.eup %2479  ;;  %vm610_vm2 = vweird.f32 %v2478_v47 }
 0x13d   : > { %2481 = vrsqrt.f32 %v602_v48  ;;  %v624_v59 = vmul.f32 %v2480_v53, %v601_v42  ;;  %vm611_vm4 = vmor %vm609_vm3, %vm610_vm2  ;;  %vm619_vm6 = vweird.f32 %v600_v49  ;;  %vm639_vm8 = vweird.f32 %v602_v48 }
 0x13e   : > { %v605_v51 = vmul.f32 %v2478_v47, %v604_v50  ;;  %2483 = vrsqrt.f32 %v600_v49  ;;  %vm630_vm11 = vweird.f32 %v2480_v53 }
 0x13f   : > { %v625_v0 = vmul.f32 %v2480_v53, %v624_v59  ;;  %vm631_vm13 = vmor %vm629_vm10, %vm630_vm11  ;;  %v709_v59 = vld [vmem:[%s2937_s15 + $0x1] sm:$0x1] }
 0x140   : > { %v606_v52 = vmul.f32 0.5, %v605_v51  ;;  %vm713_vm15 = vcmp.gt.f32.partialorder %v709_v59, 0.5 }
 0x141   : > { %v626_v6 = vmul.f32 0.5, %v625_v0 }
 0x142   : > { %v607_v54 = vsub.f32 1.5, %v606_v52 }
 0x143   : > { %v2482_v55 = vpop.eup %2481  ;;  %v627_v13 = vsub.f32 1.5, %v626_v6 }
 0x144   : > { %v2484_v56 = vpop.eup %2483  ;;  %v634_v57 = vmul.f32 %v2482_v55, %v602_v48  ;;  %v608_v58 = vmul.f32 %v2478_v47, %v607_v54  ;;  %vm640_vm9 = vweird.f32 %v2482_v55 }
 0x145   : > { %v614_v60 = vmul.f32 %v2484_v56, %v600_v49  ;;  %vm620_vm5 = vweird.f32 %v2484_v56  ;;  %vm641_vm12 = vmor %vm639_vm8, %vm640_vm9  ;;  %vm1717_vm8 = vcmask 257216  }
 0x146   : > { %v635_v61 = vmul.f32 %v2482_v55, %v634_v57  ;;  %v612_v63 = vsel %vm611_vm4, %v2478_v47, %v608_v58  ;;  %vm621_vm7 = vmor %vm619_vm6, %vm620_vm5  ;;  %vm886_vm4 = vcmask 1043456   ;;  %vm970_vm5 = vcmask 60416  }
 0x147   : > { %v615_v62 = vmul.f32 %v2484_v56, %v614_v60  ;;  %v643_v4 = vmul.f32 %v612_v63, %v575_v20  ;;  %v628_v20 = vmul.f32 %v2480_v53, %v627_v13  ;;  %v2747_v60 = vmov 0.0   ;;  %v708_v63 = vld [vmem:[%s2937_s15] sm:$0x1] }
 0x148   : > { %v636_v2 = vmul.f32 0.5, %v635_v61  ;;  %v717_v61 = vsel %vm713_vm15, -1e+09, %v2747_v60  ;;  %vm712_vm1 = vcmp.gt.f32.partialorder %v708_v63, 0.5  ;;  %vm1219_vm6 = vcmask 126016  }
 0x149   : > { %v616_v1 = vmul.f32 0.5, %v615_v62  ;;  %v650_v11 = vmul.f32 %v2467_v5, %v643_v4  ;;  %v632_v23 = vsel %vm631_vm13, %v2480_v53, %v628_v20  ;;  %v3023_v62 = vperm.slane %v717_v61, 0 }
 0x14a   : > { %v637_v8 = vsub.f32 1.5, %v636_v2  ;;  %v645_v25 = vmul.f32 %v632_v23, %v2965_v19 }
 0x14b   : > { %v617_v3 = vsub.f32 1.5, %v616_v1  ;;  %v657_v17 = vadd.f32 %v2468_v12, %v650_v11 }
 0x14c   : > { %v638_v16 = vmul.f32 %v2482_v55, %v637_v8  ;;  %v652_v27 = vmul.f32 %v2467_v5, %v645_v25 }
 0x14d   : > { %v618_v7 = vmul.f32 %v2484_v56, %v617_v3  ;;  %v716_v3 = vsel %vm712_vm1, -1e+09, %v2747_v60 }
 0x14e   : > { %v642_v22 = vsel %vm641_vm12, %v2482_v55, %v638_v16  ;;  %v3028_v4 = vperm.slane %v716_v3, 0 }
 0x14f   : > { %v622_v9 = vsel %vm621_vm7, %v2484_v56, %v618_v7  ;;  %v646_v24 = vmul.f32 %v642_v22, %v2973_v29  ;;  %vm1468_vm7 = vcmask 191616  }
 0x150   : > { %v644_v10 = vmul.f32 %v622_v9, %v576_v30  ;;  %v659_v30 = vadd.f32 %v2468_v12, %v652_v27 }
 0x151   : > { %v653_v26 = vmul.f32 %v2467_v5, %v646_v24 }
 0x152   : > { %v651_v15 = vmul.f32 %v2467_v5, %v644_v10  ;;  %v710_v10 = vld [vmem:[%s2937_s15 + $0x2] sm:$0x1] }
 0x153   : > { %v660_v28 = vadd.f32 %v2468_v12, %v653_v26  ;;  %vm714_vm2 = vcmp.gt.f32.partialorder %v710_v10, 0.5 }
 0x154   : > { %v658_v18 = vadd.f32 %v2468_v12, %v651_v15  ;;  %v718_v12 = vsel %vm714_vm2, -1e+09, %v2747_v60 }
 0x155   : > { %v662_v31 = vpack.c.bf16 %v660_v28, %v659_v30  ;;  %v3033_v13 = vperm.slane %v718_v12, 0 }
 0x156   : > { %v661_v21 = vpack.c.bf16 %v658_v18, %v657_v17 }
 0x158   : > { %2259 = vmatmul.msk.bf16.vlgmr.msra.gmra.mxu1 %vm551_vm0, %v661_v21  ;;  %v711_v21 = vld [vmem:[%s2937_s15 + $0x3] sm:$0x1]  ;;  %s2751_s15 = smov 56  }
 0x159   : > { %vm715_vm3 = vcmp.gt.f32.partialorder %v711_v21, 0.5 }
 0x15a   : > { %v719_v22 = vsel %vm715_vm3, -1e+09, %v2747_v60 }
 0x15b   : > { %v3041_v23 = vperm.slane %v719_v22, 0 }
 0x168   : > { %2260 = vmatmul.msk.bf16.gmra.mxu1 %vm551_vm0, %v662_v31 }
 0x1d5   : > { %v698_v33 = vpop.f32.mrf.mxu1 }
 0x1d6   : > { %v699_v34 = vadd.f32 %v2469_v32, %v698_v33 }
 0x1d8   : > { %v720_v35 = vpack.c.bf16 %v699_v34, %v699_v34 }
 0x1da   : > { %v737_v36 = vunpack.c.l.b16 %v720_v35 }
 0x1dc   : > { %v3002_v37 = vpack.c.b16 %v737_v36, %v737_v36 }
 0x1dd   : > { %v700_v29 = vpop.f32.mrf.mxu1 }
 0x1de   : > { %v701_v38 = vadd.f32 %v2469_v32, %v700_v29  ;;  %739 = vrot.lane.b32.xlu0 %v3002_v37, %s2746_s24 }
 0x1e0   : > { %v721_v19 = vpack.c.bf16 %v701_v38, %v701_v38 }
 0x1e2   : > { %v762_v39 = vunpack.c.l.b16 %v721_v19 }
 0x1e4   : > { %v3005_v40 = vpack.c.b16 %v762_v39, %v762_v39 }
 0x1e5   : > { %v703_v41 = vpop.f32.mrf.mxu1 }
 0x1e6   : > { %v704_v42 = vadd.f32 %v2469_v32, %v703_v41  ;;  %764 = vrot.lane.b32.xlu2 %v3005_v40, %s2746_s24 }
 0x1e8   : > { %v722_v43 = vpack.c.bf16 %v704_v42, %v704_v42 }
 0x1ea   : > { %v786_v44 = vunpack.c.l.b16 %v722_v43 }
 0x1ec   : > { %v3008_v45 = vpack.c.b16 %v786_v44, %v786_v44 }
 0x1ed   : > { %v705_v46 = vpop.f32.mrf.mxu1 }
 0x1ee   : > { %v706_v47 = vadd.f32 %v2469_v32, %v705_v46  ;;  %788 = vrot.lane.b32.xlu1 %v3008_v45, %s2746_s24 }
 0x1f0   : > { %v723_v48 = vpack.c.bf16 %v706_v47, %v706_v47 }
 0x1f2   : > { %v810_v49 = vunpack.c.l.b16 %v723_v48 }
 0x1f4   : > { %v3011_v50 = vpack.c.b16 %v810_v49, %v810_v49 }
 0x1f6   : > { %812 = vrot.lane.b32.xlu2 %v3011_v50, %s2746_s24  ;;  %s2760_s24 = smov 24  }
 0x240   : > { %v765_v51 = vpop.permute.xlu2 %764 }
 0x241   : > { %v770_v52 = vsel %vm741_vm14, %v765_v51, 0 }
 0x242   : > { %779 = vmatpush.bf16.xpose.msra.mxu2 %v770_v52 }
 0x249   : > { %2262 = vmatmul.msk.bf16.vlgmr.msra.gmra.mxu2 %vm741_vm14, %v721_v19 }
 0x250   : > { %v813_v53 = vpop.permute.xlu2 %812  ;;  %v740_v54 = vpop.permute.xlu0 %739 }
 0x251   : > { %v818_v55 = vsel %vm741_vm14, %v813_v53, 0  ;;  %v746_v56 = vsel %vm741_vm14, %v740_v54, 0 }
 0x252   : > { %755 = vmatpush.bf16.xpose.msrb.mxu1 %v746_v56 }
 0x259   : > { %2261 = vmatmul.msk.bf16.vlgmr.msrb.gmra.mxu1 %vm741_vm14, %v720_v35 }
 0x25a   : > { %827 = vmatpush.bf16.xpose.msra.mxu1 %v818_v55 }
 0x260   : > { %v789_v57 = vpop.permute.xlu1 %788 }
 0x261   : > { %v794_v58 = vsel %vm741_vm14, %v789_v57, 0 }
 0x262   : > { %803 = vmatpush.bf16.xpose.msra.mxu3 %v794_v58 }
 0x269   : > { %2263 = vmatmul.msk.bf16.vlgmr.msra.gmra.mxu3 %vm741_vm14, %v722_v43  ;;  %2264 = vmatmul.msk.bf16.vlgmr.msra.gmra.mxu1 %vm741_vm14, %v723_v48 }
 0x2cc   : > { %v781_v0 = vpop.f32.mrf.mxu2 }
 0x2cd   : > { %v782_v1 = vadd.f32 %v781_v0, %v3023_v62 }
 0x2cf   : > { %v836_v2 = vsel %vm741_vm14, %v782_v1, -inf }
 0x2d0   : > { %837 = vmax.xlane.f32.xlu2 %v836_v2 }
 0x2d4   : > { %v783_v5 = vpop.f32.mrf.mxu2 }
 0x2d6   : > { %v757_v6 = vpop.f32.mrf.mxu1 }
 0x2d7   : > { %v758_v7 = vadd.f32 %v757_v6, %v3028_v4 }
 0x2d9   : > { %v833_v8 = vsel %vm741_vm14, %v758_v7, -inf }
 0x2da   : > { %834 = vmax.xlane.f32.xlu0 %v833_v8 }
 0x2de   : > { %v759_v9 = vpop.f32.mrf.mxu1 }
 0x2e6   : > { %v829_v11 = vpop.f32.mrf.mxu1 }
 0x2e7   : > { %v830_v24 = vadd.f32 %v829_v11, %v3041_v23 }
 0x2e9   : > { %v842_v25 = vsel %vm741_vm14, %v830_v24, -inf }
 0x2ec   : > { %v805_v15 = vpop.f32.mrf.mxu3 }
 0x2ed   : > { %v806_v16 = vadd.f32 %v805_v15, %v3033_v13 }
 0x2ee   : > { %v831_v17 = vpop.f32.mrf.mxu1  ;;  %881 = vrot.lane.b32.xlu0 %v3002_v37, %s2748_s14 }
 0x2ef   : > { %v839_v18 = vsel %vm741_vm14, %v806_v16, -inf }
 0x2f0   : > { %840 = vmax.xlane.f32.xlu1 %v839_v18 }
 0x2f4   : > { %v807_v20 = vpop.f32.mrf.mxu3 }
 0x309   : > { %977 = vrot.lane.b32.xlu1 %v3002_v37, %s2749_s19 }
 0x318   : > { %843 = vmax.xlane.f32.xlu0 %v842_v25 }
 0x32c   : > { %1000 = vrot.lane.b32.xlu0 %v3005_v40, %s2749_s19 }
 0x334   : > { %975 = vrot.lane.b32.xlu0 %v3002_v37, %s2750_s18 }
 0x33c   : > { %924 = vrot.lane.b32.xlu0 %v3008_v45, %s2748_s14 }
 0x343   : > { %v838_v26 = vpop.xlane.xlu2 %837 }
 0x344   : > { %v846_v27 = vsub.f32 %v782_v1, %v838_v26  ;;  %945 = vrot.lane.b32.xlu0 %v3011_v50, %s2748_s14 }
 0x346   : > { %v851_v28 = vmul.f32 1.442695, %v846_v27 }
 0x348   : > { %2485 = vpow2.f32 %v851_v28 }
 0x34c   : > { %1023 = vrot.lane.b32.xlu0 %v3008_v45, %s2749_s19 }
 0x34d   : > { %v835_v30 = vpop.xlane.xlu0 %834 }
 0x34e   : > { %v2486_v31 = vpop.eup %2485  ;;  %v845_v32 = vsub.f32 %v758_v7, %v835_v30 }
 0x34f   : > { %v860_v33 = vsel %vm741_vm14, %v2486_v31, 0.0 }
 0x350   : > { %v849_v34 = vmul.f32 1.442695, %v845_v32  ;;  %861 = vadd.xlane.f32.xlu1 %v860_v33 }
 0x352   : > { %2487 = vpow2.f32 %v849_v34 }
 0x354   : > { %1046 = vrot.lane.b32.xlu0 %v3011_v50, %s2749_s19 }
 0x358   : > { %v2488_v35 = vpop.eup %2487 }
 0x359   : > { %v857_v36 = vsel %vm741_vm14, %v2488_v35, 0.0 }
 0x35a   : > { %858 = vadd.xlane.f32.xlu2 %v857_v36 }
 0x35c   : > { %1021 = vrot.lane.b32.xlu0 %v3008_v45, %s2750_s18 }
 0x360   : > { %v882_v29 = vpop.permute.xlu0 %881 }
 0x361   : > { %v888_v38 = vsel %vm886_vm4, %v882_v29, 0 }
 0x362   : > { %897 = vmatpush.bf16.msrb.mxu2 %v888_v38 }
 0x363   : > { %v841_v19 = vpop.xlane.xlu1 %840 }
 0x364   : > { %v847_v42 = vsub.f32 %v806_v16, %v841_v19 }
 0x366   : > { %v853_v46 = vmul.f32 1.442695, %v847_v42 }
 0x369   : > { %998 = vrot.lane.b32.xlu1 %v3005_v40, %s2750_s18 }
 0x372   : > { %903 = vrot.lane.b32.xlu2 %v3005_v40, %s2748_s14  ;;  %s2248_s14 = sshll.u32 %s2933_s6, 5 }
 0x373   : > { %s535_s19 = scalar_lea.vmem [#allocation9], %s2248_s14 }
 0x37b   : > { %v978_v39 = vpop.permute.xlu1 %977 }
 0x37c   : > { %v983_v41 = vsel %vm741_vm14, %v978_v39, 0 }
 0x37d   : > { %992 = vmatpush.bf16.xpose.msra.mxu2 %v983_v41 }
 0x38b   : > { %v844_v43 = vpop.xlane.xlu0 %843 }
 0x38c   : > { %v848_v44 = vsub.f32 %v830_v24, %v844_v43 }
 0x38e   : > { %v855_v47 = vmul.f32 1.442695, %v848_v44 }
 0x390   : > { %2489 = vpow2.f32 %v855_v47 }
 0x391   : > { %2491 = vpow2.f32 %v853_v46 }
 0x396   : > { %v2490_v48 = vpop.eup %2489 }
 0x397   : > { %v2492_v49 = vpop.eup %2491  ;;  %v866_v51 = vsel %vm741_vm14, %v2490_v48, 0.0 }
 0x398   : > { %867 = vadd.xlane.f32.xlu1 %v866_v51  ;;  %v863_v52 = vsel %vm741_vm14, %v2492_v49, 0.0 }
 0x39b   : > { %864 = vadd.xlane.f32.xlu2 %v863_v52 }
 0x39e   : > { %v1001_v53 = vpop.permute.xlu0 %1000 }
 0x39f   : > { %v1006_v8 = vsel %vm741_vm14, %v1001_v53, 0 }
 0x3a6   : > { %v976_v54 = vpop.permute.xlu0 %975 }
 0x3ae   : > { %v925_v55 = vpop.permute.xlu0 %924 }
 0x3af   : > { %v930_v56 = vsel %vm886_vm4, %v925_v55, 0 }
 0x3b0   : > { %939 = vmatpush.bf16.msra.mxu0 %v930_v56 }
 0x3b1   : > { %1115 = vrot.lane.b32.xlu1 %v3002_v37, %s2751_s15 }
 0x3b3   : > { %1044 = vrot.lane.b32.xlu2 %v3011_v50, %s2750_s18 }
 0x3b6   : > { %v946_v57 = vpop.permute.xlu0 %945 }
 0x3b7   : > { %v951_v58 = vsel %vm886_vm4, %v946_v57, 0 }
 0x3b8   : > { %960 = vmatpush.bf16.msrb.mxu0 %v951_v58 }
 0x3b9   : > { %1249 = vrot.lane.b32.xlu1 %v3005_v40, %s2752_s21 }
 0x3be   : > { %v1024_v59 = vpop.permute.xlu0 %1023 }
 0x3bf   : > { %v1029_v21 = vsel %vm741_vm14, %v1024_v59, 0 }
 0x3c3   : > { %v862_v63 = vpop.xlane.xlu1 %861 }
 0x3c4   : > { %2493 = vrcp.f32 %v862_v63 }
 0x3c6   : > { %v1047_v60 = vpop.permute.xlu0 %1046 }
 0x3c7   : > { %v1052_v61 = vsel %vm741_vm14, %v1047_v60, 0 }
 0x3c8   : > { %1061 = vmatpush.bf16.xpose.msrb.mxu1 %v1052_v61 }
 0x3ca   : > { %v2494_v1 = vpop.eup %2493 }
 0x3cb   : > { %v874_v3 = vmul.f32 %v2494_v1, %v2486_v31 }
 0x3cd   : > { %v859_v0 = vpop.xlane.xlu2 %858  ;;  %v878_v10 = vpack.c.bf16 %v874_v3, %v874_v3 }
 0x3ce   : > { %2495 = vrcp.f32 %v859_v0  ;;  %v1022_v28 = vpop.permute.xlu0 %1021 }
 0x3d4   : > { %v2496_v2 = vpop.eup %2495 }
 0x3d5   : > { %v873_v5 = vmul.f32 %v2496_v2, %v2488_v35  ;;  %v904_v6 = vpop.permute.xlu2 %903 }
 0x3d6   : > { %v909_v7 = vsel %vm886_vm4, %v904_v6, 0 }
 0x3d7   : > { %918 = vmatpush.bf16.msrb.mxu3 %v909_v7  ;;  %v877_v9 = vpack.c.bf16 %v873_v5, %v873_v5 }
 0x3d9   : > { %2265 = vmatmul.msk.bf16.vlgmr.msrb.gmra.mxu2 %vm741_vm14, %v877_v9 }
 0x3da   : > { %2266 = vmatmul.msk.bf16.vlgmr.msrb.gmra.mxu3 %vm741_vm14, %v878_v10 }
 0x3db   : > { %1015 = vmatpush.bf16.xpose.msra.mxu3 %v1006_v8  ;;  %v999_v11 = vpop.permute.xlu1 %998 }
 0x3e9   : > { %2269 = vmatmul.msk.bf16.vlgmr.msra.gmra.mxu2 %vm741_vm14, %v976_v54 }
 0x3ea   : > { %2270 = vmatmul.msk.bf16.vlgmr.msra.gmra.mxu3 %vm741_vm14, %v999_v11 }
 0x40b   : > { %v868_v18 = vpop.xlane.xlu1 %867 }
 0x40e   : > { %v865_v12 = vpop.xlane.xlu2 %864 }
 0x40f   : > { %2497 = vrcp.f32 %v865_v12 }
 0x410   : > { %2499 = vrcp.f32 %v868_v18 }
 0x415   : > { %v2498_v15 = vpop.eup %2497 }
 0x416   : > { %v1045_v16 = vpop.permute.xlu2 %1044  ;;  %v875_v17 = vmul.f32 %v2498_v15, %v2492_v49  ;;  %v2500_v22 = vpop.eup %2499 }
 0x417   : > { %2272 = vmatmul.msk.bf16.vlgmr.msrb.gmra.mxu1 %vm741_vm14, %v1045_v16  ;;  %v876_v25 = vmul.f32 %v2500_v22, %v2490_v48 }
 0x418   : > { %v879_v20 = vpack.c.bf16 %v875_v17, %v875_v17 }
 0x419   : > { %v880_v27 = vpack.c.bf16 %v876_v25, %v876_v25 }
 0x41a   : > { %2267 = vmatmul.msk.bf16.vlgmr.msra.gmra.mxu0 %vm741_vm14, %v879_v20 }
 0x41b   : > { %1038 = vmatpush.bf16.xpose.msra.mxu0 %v1029_v21 }
 0x423   : > { %v1116_v24 = vpop.permute.xlu1 %1115 }
 0x424   : > { %v1121_v26 = vsel %vm886_vm4, %v1116_v24, 0 }
 0x425   : > { %1130 = vmatpush.bf16.msrb.mxu2 %v1121_v26 }
 0x42a   : > { %2268 = vmatmul.msk.bf16.vlgmr.msrb.gmra.mxu0 %vm741_vm14, %v880_v27 }
 0x42b   : > { %v1250_v60 = vpop.permute.xlu1 %1249 }
 0x42c   : > { %v1255_v11 = vsel %vm741_vm14, %v1250_v60, 0 }
 0x43a   : > { %2271 = vmatmul.msk.bf16.vlgmr.msra.gmra.mxu0 %vm741_vm14, %v1022_v28 }
 0x45c   : > { %v899_v30 = vpop.f32.mrf.mxu2 }
 0x45d   : > { %v966_v31 = vpack.c.bf16 %v899_v30, %v899_v30  ;;  %v920_v32 = vpop.f32.mrf.mxu3 }
 0x45e   : > { %v967_v33 = vpack.c.bf16 %v920_v32, %v920_v32 }
 0x45f   : > { %971 = vst.msk [vmem:[#allocation2] sm:$0xf] %vm970_vm5, %v966_v31 }
 0x460   : > { %972 = vst.msk [vmem:[#allocation2 + $0x4] sm:$0xf] %vm970_vm5, %v967_v33 }
 0x464   : > { %v901_v34 = vpop.f32.mrf.mxu2 }
 0x465   : > { %v922_v35 = vpop.f32.mrf.mxu3 }
 0x46c   : > { %v994_v36 = vpop.f32.mrf.mxu2 }
 0x46d   : > { %v995_v29 = vadd.f32 %v994_v36, %v3028_v4  ;;  %v1017_v38 = vpop.f32.mrf.mxu3 }
 0x46e   : > { %v1018_v19 = vadd.f32 %v1017_v38, %v3023_v62 }
 0x46f   : > { %v1067_v39 = vsel %vm741_vm14, %v995_v29, -inf }
 0x470   : > { %1068 = vmax.xlane.f32.xlu0 %v1067_v39  ;;  %v1070_v41 = vsel %vm741_vm14, %v1018_v19, -inf }
 0x471   : > { %1071 = vmax.xlane.f32.xlu1 %v1070_v41 }
 0x474   : > { %v996_v42 = vpop.f32.mrf.mxu2 }
 0x475   : > { %v1019_v43 = vpop.f32.mrf.mxu3 }
 0x484   : > { %1136 = vrot.lane.b32.xlu0 %v3005_v40, %s2751_s15 }
 0x48c   : > { %1224 = vrot.lane.b32.xlu0 %v3002_v37, %s2753_s22 }
 0x494   : > { %v1063_v44 = vpop.f32.mrf.mxu1 }
 0x495   : > { %v1064_v46 = vadd.f32 %v1063_v44, %v3041_v23 }
 0x497   : > { %v941_v47 = vpop.f32.mrf.mxu0  ;;  %v1076_v48 = vsel %vm741_vm14, %v1064_v46, -inf }
 0x498   : > { %v968_v49 = vpack.c.bf16 %v941_v47, %v941_v47  ;;  %1077 = vmax.xlane.f32.xlu2 %v1076_v48 }
 0x49a   : > { %973 = vst.msk [vmem:[#allocation2 + $0x8] sm:$0xf] %vm970_vm5, %v968_v49 }
 0x49c   : > { %v1065_v51 = vpop.f32.mrf.mxu1 }
 0x49f   : > { %v943_v52 = vpop.f32.mrf.mxu0 }
 0x4a7   : > { %v962_v53 = vpop.f32.mrf.mxu0 }
 0x4a8   : > { %v969_v54 = vpack.c.bf16 %v962_v53, %v962_v53 }
 0x4aa   : > { %974 = vst.msk [vmem:[#allocation2 + $0xc] sm:$0xf] %vm970_vm5, %v969_v54 }
 0x4af   : > { %v964_v55 = vpop.f32.mrf.mxu0 }
 0x4b0   : > { %1226 = vrot.lane.b32.xlu2 %v3002_v37, %s2752_s21 }
 0x4b7   : > { %v1040_v56 = vpop.f32.mrf.mxu0 }
 0x4b8   : > { %v1041_v57 = vadd.f32 %v1040_v56, %v3033_v13  ;;  %1157 = vrot.lane.b32.xlu2 %v3008_v45, %s2751_s15 }
 0x4ba   : > { %v1073_v58 = vsel %vm741_vm14, %v1041_v57, -inf }
 0x4bb   : > { %1074 = vmax.xlane.f32.xlu1 %v1073_v58 }
 0x4bf   : > { %v1042_v59 = vpop.f32.mrf.mxu0 }
 0x4c0   : > { %1178 = vrot.lane.b32.xlu2 %v3011_v50, %s2751_s15 }
 0x4c8   : > { %1272 = vrot.lane.b32.xlu2 %v3008_v45, %s2752_s21 }
 0x4d0   : > { %1295 = vrot.lane.b32.xlu2 %v3011_v50, %s2752_s21  ;;  %s3430_s21 = sld [smem:[#allocation20_spill]] }
 0x4d6   : > { %s2687_s14 = scalar_lea.hbm %s3430_s21, 64 }
 0x4d8   : > { %1293 = vrot.lane.b32.xlu2 %v3011_v50, %s2753_s22 }
 0x4e3   : > { %v1069_v61 = vpop.xlane.xlu0 %1068 }
 0x4e4   : > { %v1079_v63 = vsub.f32 %v995_v29, %v1069_v61  ;;  %v1072_v0 = vpop.xlane.xlu1 %1071 }
 0x4e5   : > { %v1080_v2 = vsub.f32 %v1018_v19, %v1072_v0 }
 0x4e6   : > { %v1083_v1 = vmul.f32 1.442695, %v1079_v63 }
 0x4e7   : > { %v1085_v3 = vmul.f32 1.442695, %v1080_v2 }
 0x4e8   : > { %2501 = vpow2.f32 %v1083_v1 }
 0x4e9   : > { %2503 = vpow2.f32 %v1085_v3 }
 0x4ee   : > { %v2502_v5 = vpop.eup %2501 }
 0x4ef   : > { %v1091_v6 = vsel %vm741_vm14, %v2502_v5, 0.0  ;;  %v2504_v7 = vpop.eup %2503 }
 0x4f0   : > { %1092 = vadd.xlane.f32.xlu1 %v1091_v6  ;;  %v1094_v10 = vsel %vm741_vm14, %v2504_v7, 0.0 }
 0x4f6   : > { %v1137_v8 = vpop.permute.xlu0 %1136 }
 0x4f7   : > { %v1142_v9 = vsel %vm886_vm4, %v1137_v8, 0 }
 0x4f8   : > { %1095 = vadd.xlane.f32.xlu1 %v1094_v10  ;;  %1151 = vmatpush.bf16.msrb.mxu3 %v1142_v9 }
 0x4fc   : > { %1264 = vmatpush.bf16.xpose.msra.mxu3 %v1255_v11 }
 0x50b   : > { %v1078_v12 = vpop.xlane.xlu2 %1077 }
 0x50c   : > { %v1082_v22 = vsub.f32 %v1064_v46, %v1078_v12  ;;  %v1225_v46 = vpop.permute.xlu0 %1224 }
 0x50e   : > { %v1089_v26 = vmul.f32 1.442695, %v1082_v22 }
 0x510   : > { %2505 = vpow2.f32 %v1089_v26 }
 0x511   : > { %1247 = vrot.lane.b32.xlu1 %v3005_v40, %s2753_s22 }
 0x513   : > { %v1227_v15 = vpop.permute.xlu2 %1226 }
 0x514   : > { %v1232_v16 = vsel %vm741_vm14, %v1227_v15, 0 }
 0x515   : > { %1241 = vmatpush.bf16.xpose.msra.mxu2 %v1232_v16 }
 0x516   : > { %v2506_v33 = vpop.eup %2505 }
 0x517   : > { %v1100_v36 = vsel %vm741_vm14, %v2506_v33, 0.0 }
 0x51b   : > { %v1158_v17 = vpop.permute.xlu2 %1157 }
 0x51c   : > { %v1163_v18 = vsel %vm886_vm4, %v1158_v17, 0 }
 0x51d   : > { %1172 = vmatpush.bf16.msrb.mxu0 %v1163_v18 }
 0x523   : > { %v1179_v20 = vpop.permute.xlu2 %1178 }
 0x524   : > { %v1184_v21 = vsel %vm886_vm4, %v1179_v20, 0 }
 0x525   : > { %1193 = vmatpush.bf16.msra.mxu1 %v1184_v21 }
 0x52b   : > { %v1273_v24 = vpop.permute.xlu2 %1272 }
 0x52c   : > { %v1278_v25 = vsel %vm741_vm14, %v1273_v24, 0 }
 0x52d   : > { %1287 = vmatpush.bf16.xpose.msra.mxu0 %v1278_v25 }
 0x52e   : > { %v1075_v27 = vpop.xlane.xlu1 %1074 }
 0x52f   : > { %v1081_v28 = vsub.f32 %v1041_v57, %v1075_v27 }
 0x531   : > { %v1087_v30 = vmul.f32 1.442695, %v1081_v28 }
 0x533   : > { %2507 = vpow2.f32 %v1087_v30  ;;  %v1296_v31 = vpop.permute.xlu2 %1295 }
 0x534   : > { %v1301_v32 = vsel %vm741_vm14, %v1296_v31, 0 }
 0x535   : > { %1310 = vmatpush.bf16.xpose.msrb.mxu1 %v1301_v32 }
 0x539   : > { %v2508_v34 = vpop.eup %2507 }
 0x53a   : > { %v1097_v35 = vsel %vm741_vm14, %v2508_v34, 0.0 }
 0x53b   : > { %1098 = vadd.xlane.f32.xlu0 %v1097_v35  ;;  %1101 = vadd.xlane.f32.xlu1 %v1100_v36  ;;  %v1294_v57 = vpop.permute.xlu2 %1293 }
 0x54f   : > { %1270 = vrot.lane.b32.xlu0 %v3008_v45, %s2753_s22 }
 0x563   : > { %v1093_v29 = vpop.xlane.xlu1 %1092 }
 0x564   : > { %2509 = vrcp.f32 %v1093_v29 }
 0x56a   : > { %v2510_v38 = vpop.eup %2509 }
 0x56b   : > { %v1107_v19 = vmul.f32 %v2510_v38, %v2502_v5  ;;  %v1096_v39 = vpop.xlane.xlu1 %1095 }
 0x56c   : > { %2511 = vrcp.f32 %v1096_v39 }
 0x56d   : > { %v1111_v41 = vpack.c.bf16 %v1107_v19, %v1107_v19 }
 0x56f   : > { %2273 = vmatmul.msk.bf16.vlgmr.msrb.gmra.mxu2 %vm741_vm14, %v1111_v41 }
 0x572   : > { %v2512_v42 = vpop.eup %2511 }
 0x573   : > { %v1108_v43 = vmul.f32 %v2512_v42, %v2504_v7 }
 0x575   : > { %v1112_v44 = vpack.c.bf16 %v1108_v43, %v1108_v43 }
 0x577   : > { %2274 = vmatmul.msk.bf16.vlgmr.msrb.gmra.mxu3 %vm741_vm14, %v1112_v44 }
 0x57f   : > { %2277 = vmatmul.msk.bf16.vlgmr.msra.gmra.mxu2 %vm741_vm14, %v1225_v46 }
 0x583   : > { %v1248_v47 = vpop.permute.xlu1 %1247 }
 0x587   : > { %2278 = vmatmul.msk.bf16.vlgmr.msra.gmra.mxu3 %vm741_vm14, %v1248_v47 }
 0x5ae   : > { %v1102_v48 = vpop.xlane.xlu1 %1101  ;;  %v1099_v49 = vpop.xlane.xlu0 %1098 }
 0x5af   : > { %2513 = vrcp.f32 %v1102_v48 }
 0x5b0   : > { %2515 = vrcp.f32 %v1099_v49 }
 0x5b5   : > { %v2514_v51 = vpop.eup %2513 }
 0x5b6   : > { %v2516_v52 = vpop.eup %2515  ;;  %v1110_v53 = vmul.f32 %v2514_v51, %v2506_v33 }
 0x5b7   : > { %v1109_v54 = vmul.f32 %v2516_v52, %v2508_v34 }
 0x5b8   : > { %v1114_v55 = vpack.c.bf16 %v1110_v53, %v1110_v53 }
 0x5b9   : > { %v1113_v56 = vpack.c.bf16 %v1109_v54, %v1109_v54 }
 0x5ba   : > { %2276 = vmatmul.msk.bf16.vlgmr.msra.gmra.mxu1 %vm741_vm14, %v1114_v55 }
 0x5bb   : > { %2275 = vmatmul.msk.bf16.vlgmr.msrb.gmra.mxu0 %vm741_vm14, %v1113_v56 }
 0x5c1   : > { %v1271_v58 = vpop.permute.xlu0 %1270 }
 0x5ca   : > { %2280 = vmatmul.msk.bf16.vlgmr.msrb.gmra.mxu1 %vm741_vm14, %v1294_v57 }
 0x5cb   : > { %2279 = vmatmul.msk.bf16.vlgmr.msra.gmra.mxu0 %vm741_vm14, %v1271_v58 }
 0x5f2   : > { %v3138_v59 = vpop.f32.mrf.mxu2 }
 0x5fa   : > { %v1134_v60 = vpop.f32.mrf.mxu2  ;;  %v3140_v61 = vpop.f32.mrf.mxu3 }
 0x602   : > { %v1155_v63 = vpop.f32.mrf.mxu3  ;;  %v1243_v0 = vpop.f32.mrf.mxu2 }
 0x603   : > { %v1244_v1 = vadd.f32 %v1243_v0, %v3028_v4 }
 0x605   : > { %v1316_v2 = vsel %vm741_vm14, %v1244_v1, -inf }
 0x606   : > { %1317 = vmax.xlane.f32.xlu1 %v1316_v2 }
 0x60a   : > { %v1245_v3 = vpop.f32.mrf.mxu2  ;;  %v1266_v5 = vpop.f32.mrf.mxu3 }
 0x60b   : > { %v1267_v6 = vadd.f32 %v1266_v5, %v3023_v62 }
 0x60d   : > { %v1319_v7 = vsel %vm741_vm14, %v1267_v6, -inf }
 0x60e   : > { %1320 = vmax.xlane.f32.xlu2 %v1319_v7 }
 0x612   : > { %v1268_v8 = vpop.f32.mrf.mxu3 }
 0x61f   : > { %1364 = vrot.lane.b32.xlu1 %v3002_v37, %s2754_s26 }
 0x626   : > { %1385 = vrot.lane.b32.xlu2 %v3005_v40, %s2754_s26 }
 0x637   : > { %v3148_v9 = vpop.f32.mrf.mxu1 }
 0x638   : > { %v3150_v10 = vpop.f32.mrf.mxu0 }
 0x63f   : > { %v1197_v11 = vpop.f32.mrf.mxu1 }
 0x640   : > { %v1176_v12 = vpop.f32.mrf.mxu0 }
 0x647   : > { %v1312_v15 = vpop.f32.mrf.mxu1 }
 0x648   : > { %v1289_v16 = vpop.f32.mrf.mxu0  ;;  %v1313_v17 = vadd.f32 %v1312_v15, %v3041_v23 }
 0x649   : > { %v1290_v18 = vadd.f32 %v1289_v16, %v3033_v13 }
 0x64a   : > { %v1325_v20 = vsel %vm741_vm14, %v1313_v17, -inf }
 0x64b   : > { %1326 = vmax.xlane.f32.xlu0 %v1325_v20  ;;  %v1322_v21 = vsel %vm741_vm14, %v1290_v18, -inf }
 0x64c   : > { %1323 = vmax.xlane.f32.xlu1 %v1322_v21 }
 0x64f   : > { %v1314_v22 = vpop.f32.mrf.mxu1 }
 0x650   : > { %v1291_v24 = vpop.f32.mrf.mxu0 }
 0x65f   : > { %1475 = vrot.lane.b32.xlu0 %v3002_v37, %s2755_s25 }
 0x665   : > { %1498 = vrot.lane.b32.xlu1 %v3005_v40, %s2755_s25 }
 0x667   : > { %1473 = vrot.lane.b32.xlu0 %v3002_v37, %s2756_s28 }
 0x66f   : > { %1496 = vrot.lane.b32.xlu0 %v3005_v40, %s2756_s28 }
 0x677   : > { %1406 = vrot.lane.b32.xlu0 %v3008_v45, %s2754_s26 }
 0x679   : > { %v1318_v25 = vpop.xlane.xlu1 %1317 }
 0x67a   : > { %v1328_v26 = vsub.f32 %v1244_v1, %v1318_v25 }
 0x67c   : > { %v1332_v27 = vmul.f32 1.442695, %v1328_v26 }
 0x67e   : > { %2517 = vpow2.f32 %v1332_v27 }
 0x67f   : > { %1427 = vrot.lane.b32.xlu0 %v3011_v50, %s2754_s26  ;;  %s2130_s26 = sshll.u32 %s535_s19, 4  ;;  %s2131_s26 = int_to_ptr.vmem [resolvable:$true] %s2130_s26 }
 0x681   : > { %v1321_v28 = vpop.xlane.xlu2 %1320 }
 0x682   : > { %v1329_v30 = vsub.f32 %v1267_v6, %v1321_v28 }
 0x684   : > { %v1334_v31 = vmul.f32 1.442695, %v1329_v30  ;;  %v2518_v34 = vpop.eup %2517 }
 0x685   : > { %v1340_v35 = vsel %vm741_vm14, %v2518_v34, 0.0 }
 0x686   : > { %2519 = vpow2.f32 %v1334_v31 }
 0x687   : > { %1521 = vrot.lane.b32.xlu0 %v3008_v45, %s2755_s25 }
 0x689   : > { %v1386_v32 = vpop.permute.xlu2 %1385 }
 0x68a   : > { %v1391_v33 = vsel %vm886_vm4, %v1386_v32, 0 }
 0x68b   : > { %1400 = vmatpush.bf16.msrb.mxu3 %v1391_v33 }
 0x68c   : > { %v2520_v38 = vpop.eup %2519 }
 0x68d   : > { %v1343_v19 = vsel %vm741_vm14, %v2520_v38, 0.0 }
 0x68f   : > { %1341 = vadd.xlane.f32.xlu1 %v1340_v35  ;;  %1542 = vrot.lane.b32.xlu0 %v3011_v50, %s2756_s28 }
 0x691   : > { %v1365_v36 = vpop.permute.xlu1 %1364 }
 0x692   : > { %v1370_v29 = vsel %vm886_vm4, %v1365_v36, 0 }
 0x693   : > { %1379 = vmatpush.bf16.msrb.mxu2 %v1370_v29 }
 0x697   : > { %1344 = vadd.xlane.f32.xlu1 %v1343_v19 }
 0x6be   : > { %v1327_v39 = vpop.xlane.xlu0 %1326 }
 0x6bf   : > { %v1324_v41 = vpop.xlane.xlu1 %1323  ;;  %v1331_v42 = vsub.f32 %v1313_v17, %v1327_v39 }
 0x6c0   : > { %v1330_v43 = vsub.f32 %v1290_v18, %v1324_v41 }
 0x6c1   : > { %v1338_v44 = vmul.f32 1.442695, %v1331_v42 }
 0x6c2   : > { %v1336_v46 = vmul.f32 1.442695, %v1330_v43 }
 0x6c3   : > { %2521 = vpow2.f32 %v1338_v44 }
 0x6c4   : > { %2523 = vpow2.f32 %v1336_v46 }
 0x6c9   : > { %v2522_v47 = vpop.eup %2521 }
 0x6ca   : > { %v2524_v48 = vpop.eup %2523  ;;  %v1349_v49 = vsel %vm741_vm14, %v2522_v47, 0.0 }
 0x6cb   : > { %v1346_v51 = vsel %vm741_vm14, %v2524_v48, 0.0  ;;  %1350 = vadd.xlane.f32.xlu2 %v1349_v49 }
 0x6cc   : > { %1347 = vadd.xlane.f32.xlu1 %v1346_v51 }
 0x6d1   : > { %v1476_v52 = vpop.permute.xlu0 %1475 }
 0x6d2   : > { %v1481_v53 = vsel %vm741_vm14, %v1476_v52, 0 }
 0x6d3   : > { %1490 = vmatpush.bf16.xpose.msra.mxu2 %v1481_v53 }
 0x6d7   : > { %v1499_v54 = vpop.permute.xlu1 %1498 }
 0x6d8   : > { %v1504_v55 = vsel %vm741_vm14, %v1499_v54, 0 }
 0x6d9   : > { %1513 = vmatpush.bf16.xpose.msra.mxu3 %v1504_v55  ;;  %v1474_v56 = vpop.permute.xlu0 %1473 }
 0x6e1   : > { %v1497_v57 = vpop.permute.xlu0 %1496 }
 0x6e3   : > { %1519 = vrot.lane.b32.xlu2 %v3008_v45, %s2756_s28 }
 0x6e5   : > { %1544 = vrot.lane.b32.xlu1 %v3011_v50, %s2755_s25 }
 0x6e9   : > { %v1407_v58 = vpop.permute.xlu0 %1406 }
 0x6ea   : > { %v1412_v60 = vsel %vm886_vm4, %v1407_v58, 0 }
 0x6eb   : > { %1421 = vmatpush.bf16.msrb.mxu0 %v1412_v60 }
 0x6f1   : > { %v1428_v63 = vpop.permute.xlu0 %1427 }
 0x6f2   : > { %v1433_v0 = vsel %vm886_vm4, %v1428_v63, 0 }
 0x6f3   : > { %1442 = vmatpush.bf16.msra.mxu1 %v1433_v0 }
 0x6f9   : > { %v1522_v1 = vpop.permute.xlu0 %1521 }
 0x6fa   : > { %v1527_v2 = vsel %vm741_vm14, %v1522_v1, 0 }
 0x6fb   : > { %1536 = vmatpush.bf16.xpose.msra.mxu0 %v1527_v2 }
 0x701   : > { %v1543_v30 = vpop.permute.xlu0 %1542 }
 0x702   : > { %v1342_v3 = vpop.xlane.xlu1 %1341 }
 0x703   : > { %2525 = vrcp.f32 %v1342_v3 }
 0x709   : > { %v2526_v5 = vpop.eup %2525 }
 0x70a   : > { %v1356_v6 = vmul.f32 %v2526_v5, %v2518_v34  ;;  %v1345_v7 = vpop.xlane.xlu1 %1344 }
 0x70b   : > { %2527 = vrcp.f32 %v1345_v7 }
 0x70c   : > { %v1360_v8 = vpack.c.bf16 %v1356_v6, %v1356_v6 }
 0x70e   : > { %2281 = vmatmul.msk.bf16.vlgmr.msrb.gmra.mxu2 %vm741_vm14, %v1360_v8 }
 0x711   : > { %v2528_v11 = vpop.eup %2527 }
 0x712   : > { %v1357_v12 = vmul.f32 %v2528_v11, %v2520_v38 }
 0x714   : > { %v1361_v15 = vpack.c.bf16 %v1357_v12, %v1357_v12 }
 0x716   : > { %2282 = vmatmul.msk.bf16.vlgmr.msrb.gmra.mxu3 %vm741_vm14, %v1361_v15 }
 0x71e   : > { %2285 = vmatmul.msk.bf16.vlgmr.msra.gmra.mxu2 %vm741_vm14, %v1474_v56 }
 0x726   : > { %2286 = vmatmul.msk.bf16.vlgmr.msra.gmra.mxu3 %vm741_vm14, %v1497_v57 }
 0x73e   : > { %v1351_v16 = vpop.xlane.xlu2 %1350 }
 0x73f   : > { %v1348_v17 = vpop.xlane.xlu1 %1347  ;;  %2529 = vrcp.f32 %v1351_v16 }
 0x740   : > { %2531 = vrcp.f32 %v1348_v17 }
 0x745   : > { %v2530_v18 = vpop.eup %2529 }
 0x746   : > { %v2532_v20 = vpop.eup %2531  ;;  %v1359_v21 = vmul.f32 %v2530_v18, %v2522_v47  ;;  %v1520_v28 = vpop.permute.xlu2 %1519 }
 0x747   : > { %v1358_v22 = vmul.f32 %v2532_v20, %v2524_v48 }
 0x748   : > { %v1363_v24 = vpack.c.bf16 %v1359_v21, %v1359_v21 }
 0x749   : > { %v1362_v25 = vpack.c.bf16 %v1358_v22, %v1358_v22 }
 0x74a   : > { %2284 = vmatmul.msk.bf16.vlgmr.msra.gmra.mxu1 %vm741_vm14, %v1363_v24 }
 0x74b   : > { %2283 = vmatmul.msk.bf16.vlgmr.msrb.gmra.mxu0 %vm741_vm14, %v1362_v25 }
 0x757   : > { %v1545_v26 = vpop.permute.xlu1 %1544 }
 0x758   : > { %v1550_v27 = vsel %vm741_vm14, %v1545_v26, 0 }
 0x759   : > { %1559 = vmatpush.bf16.xpose.msrb.mxu1 %v1550_v27 }
 0x75b   : > { %2287 = vmatmul.msk.bf16.vlgmr.msra.gmra.mxu0 %vm741_vm14, %v1520_v28 }
 0x760   : > { %2288 = vmatmul.msk.bf16.vlgmr.msrb.gmra.mxu1 %vm741_vm14, %v1543_v30 }
 0x791   : > { %v1381_v31 = vpop.f32.mrf.mxu2 }
 0x792   : > { %v1448_v3 = vpack.c.bf16 %v1381_v31, %v1381_v31 }
 0x799   : > { %v1383_v32 = vpop.f32.mrf.mxu2  ;;  %v1402_v33 = vpop.f32.mrf.mxu3 }
 0x7a1   : > { %v1404_v34 = vpop.f32.mrf.mxu3  ;;  %v1492_v35 = vpop.f32.mrf.mxu2 }
 0x7a2   : > { %v1493_v36 = vadd.f32 %v1492_v35, %v3028_v4 }
 0x7a4   : > { %v1565_v29 = vsel %vm741_vm14, %v1493_v36, -inf }
 0x7a5   : > { %1566 = vmax.xlane.f32.xlu0 %v1565_v29 }
 0x7a9   : > { %v1494_v38 = vpop.f32.mrf.mxu2  ;;  %v1515_v19 = vpop.f32.mrf.mxu3 }
 0x7aa   : > { %v3197_v39 = vadd.f32 %v1515_v19, %v3023_v62  ;;  %v1200_v62 = vpack.c.bf16 %v3140_v61, %v3140_v61  ;;  %v1201_v61 = vpack.c.bf16 %v3150_v10, %v3150_v10  ;;  %v1199_v10 = vpack.c.bf16 %v3138_v59, %v3138_v59 }
 0x7ac   : > { %v1568_v41 = vsel %vm741_vm14, %v3197_v39, -inf }
 0x7ad   : > { %1569 = vmax.xlane.f32.xlu1 %v1568_v41 }
 0x7b1   : > { %v1517_v42 = vpop.f32.mrf.mxu3 }
 0x7c6   : > { %1613 = vrot.lane.b32.xlu1 %v3002_v37, %s2757_s23  ;;  %v1449_v37 = vpack.c.bf16 %v1402_v33, %v1402_v33 }
 0x7c7   : > { %v1444_v43 = vpop.f32.mrf.mxu1 }
 0x7c8   : > { %v3203_v44 = vpop.f32.mrf.mxu0 }
 0x7ce   : > { %1676 = vrot.lane.b32.xlu1 %v3011_v50, %s2757_s23 }
 0x7cf   : > { %v1446_v4 = vpop.f32.mrf.mxu1 }
 0x7d0   : > { %v1425_v46 = vpop.f32.mrf.mxu0 }
 0x7d6   : > { %1209 = vrot.lane.b32.xlu1 %v1200_v62, %s2758_s10 }
 0x7d8   : > { %v1538_v47 = vpop.f32.mrf.mxu0 }
 0x7d9   : > { %v1539_v48 = vadd.f32 %v1538_v47, %v3033_v13  ;;  %v1451_v13 = vpack.c.bf16 %v1444_v43, %v1444_v43 }
 0x7db   : > { %v1571_v49 = vsel %vm741_vm14, %v1539_v48, -inf }
 0x7dc   : > { %1572 = vmax.xlane.f32.xlu2 %v1571_v49 }
 0x7dd   : > { %v1561_v51 = vpop.f32.mrf.mxu1 }
 0x7de   : > { %v1562_v52 = vadd.f32 %v1561_v51, %v3041_v23  ;;  %1458 = vrot.lane.b32.xlu1 %v1449_v37, %s2759_s20  ;;  %v1202_v51 = vpack.c.bf16 %v3148_v9, %v3148_v9 }
 0x7e0   : > { %v1540_v50 = vpop.f32.mrf.mxu0  ;;  %v1574_v53 = vsel %vm741_vm14, %v1562_v52, -inf }
 0x7e1   : > { %1575 = vmax.xlane.f32.xlu0 %v1574_v53 }
 0x7e5   : > { %v1563_v54 = vpop.f32.mrf.mxu1 }
 0x7e6   : > { %1211 = vrot.lane.b32.xlu1 %v1201_v61, %s2758_s10 }
 0x7ee   : > { %1462 = vrot.lane.b32.xlu1 %v1451_v13, %s2759_s20 }
 0x818   : > { %v1567_v55 = vpop.xlane.xlu0 %1566 }
 0x819   : > { %v1577_v56 = vsub.f32 %v1493_v36, %v1567_v55 }
 0x81b   : > { %v1581_v57 = vmul.f32 1.442695, %v1577_v56  ;;  %v1450_v56 = vpack.c.bf16 %v3203_v44, %v3203_v44 }
 0x81d   : > { %2533 = vpow2.f32 %v1581_v57 }
 0x820   : > { %v1570_v60 = vpop.xlane.xlu1 %1569 }
 0x821   : > { %v1578_v59 = vsub.f32 %v3197_v39, %v1570_v60 }
 0x823   : > { %v2534_v23 = vpop.eup %2533  ;;  %v1583_v12 = vmul.f32 1.442695, %v1578_v59  ;;  %v2573_v59 = vld [vmem:[%s2951_s29] sm:$0xff] }
 0x824   : > { %v1589_v58 = vsel %vm741_vm14, %v2534_v23, 0.0 }
 0x825   : > { %1590 = vadd.xlane.f32.xlu0 %v1589_v58 }
 0x838   : > { %v1614_v63 = vpop.permute.xlu1 %1613 }
 0x839   : > { %v1619_v0 = vsel %vm886_vm4, %v1614_v63, 0  ;;  %1634 = vrot.lane.b32.xlu0 %v3005_v40, %s2757_s23  ;;  %v2367_v63 = vld [vmem:[#allocation6 + $0x8] sm:$0xff] }
 0x83a   : > { %1628 = vmatpush.bf16.msrb.mxu2 %v1619_v0  ;;  %v2366_v0 = vld [vmem:[#allocation6] sm:$0xff] }
 0x83e   : > { %1768 = vmatpush.bf16.msra.mxu2 %v2367_v63 }
 0x840   : > { %v1677_v1 = vpop.permute.xlu1 %1676 }
 0x841   : > { %v1682_v2 = vsel %vm886_vm4, %v1677_v1, 0  ;;  %1207 = vrot.lane.b32.xlu0 %v1199_v10, %s2758_s10 }
 0x842   : > { %1691 = vmatpush.bf16.msra.mxu1 %v1682_v2  ;;  %1769 = vmatpush.bf16.msra.mxu2 %v2366_v0 }
 0x848   : > { %v1210_v5 = vpop.permute.xlu1 %1209 }
 0x849   : > { %1221 = vst.msk [vmem:[#allocation2 + $0x4] sm:$0xf] %vm1219_vm6, %v1210_v5  ;;  %1456 = vrot.lane.b32.xlu0 %v1448_v3, %s2759_s20 }
 0x84f   : > { %v1573_v15 = vpop.xlane.xlu2 %1572 }
 0x850   : > { %v1459_v6 = vpop.permute.xlu1 %1458  ;;  %v1579_v17 = vsub.f32 %v1539_v48, %v1573_v15 }
 0x851   : > { %1470 = vst.msk [vmem:[#allocation2 + $0x4] sm:$0xf] %vm1468_vm7, %v1459_v6  ;;  %v2470_v6 = vld [vmem:[%s3401_s7] ss:$0 sm:$0xff] }
 0x852   : > { %v1585_v20 = vmul.f32 1.442695, %v1579_v17 }
 0x854   : > { %v1576_v40 = vpop.xlane.xlu0 %1575 }
 0x855   : > { %v1580_v7 = vsub.f32 %v1562_v52, %v1576_v40 }
 0x857   : > { %v1587_v8 = vmul.f32 1.442695, %v1580_v7 }
 0x858   : > { %v1212_v11 = vpop.permute.xlu1 %1211 }
 0x859   : > { %2535 = vpow2.f32 %v1587_v8  ;;  %1222 = vst.msk [vmem:[#allocation2 + $0x8] sm:$0xf] %vm1219_vm6, %v1212_v11 }
 0x85a   : > { %2537 = vpow2.f32 %v1583_v12 }
 0x85b   : > { %2539 = vpow2.f32 %v1585_v20 }
 0x85f   : > { %v2536_v16 = vpop.eup %2535 }
 0x860   : > { %v1598_v18 = vsel %vm741_vm14, %v2536_v16, 0.0  ;;  %v2538_v21 = vpop.eup %2537  ;;  %v1463_v60 = vpop.permute.xlu1 %1462 }
 0x861   : > { %1599 = vadd.xlane.f32.xlu2 %v1598_v18  ;;  %v1592_v22 = vsel %vm741_vm14, %v2538_v21, 0.0  ;;  %v2540_v24 = vpop.eup %2539 }
 0x862   : > { %v1595_v25 = vsel %vm741_vm14, %v2540_v24, 0.0 }
 0x869   : > { %1593 = vadd.xlane.f32.xlu2 %v1592_v22  ;;  %v2575_v22 = vld [vmem:[%s2951_s29 + $0x10] sm:$0xff] }
 0x871   : > { %1596 = vadd.xlane.f32.xlu2 %v1595_v25 }
 0x889   : > { %1655 = vrot.lane.b32.xlu2 %v3008_v45, %s2757_s23 }
 0x898   : > { %v1591_v26 = vpop.xlane.xlu0 %1590 }
 0x899   : > { %2541 = vrcp.f32 %v1591_v26 }
 0x89f   : > { %v2542_v27 = vpop.eup %2541 }
 0x8a0   : > { %v1605_v28 = vmul.f32 %v2542_v27, %v2534_v23 }
 0x8a2   : > { %v1609_v30 = vpack.c.bf16 %v1605_v28, %v1605_v28  ;;  %v2576_v28 = vld [vmem:[%s2951_s29 + $0x18] sm:$0xff] }
 0x8a4   : > { %2289 = vmatmul.msk.bf16.vlgmr.msrb.gmra.mxu2 %vm741_vm14, %v1609_v30 }
 0x8ab   : > { %v1635_v31 = vpop.permute.xlu0 %1634 }
 0x8ac   : > { %v1640_v32 = vsel %vm886_vm4, %v1635_v31, 0 }
 0x8ad   : > { %1649 = vmatpush.bf16.msrb.mxu3 %v1640_v32 }
 0x8b3   : > { %v1208_v33 = vpop.permute.xlu0 %1207 }
 0x8b4   : > { %1220 = vst.msk [vmem:[#allocation2] sm:$0xf] %vm1219_vm6, %v1208_v33 }
 0x8bb   : > { %v1457_v34 = vpop.permute.xlu0 %1456 }
 0x8bc   : > { %1469 = vst.msk [vmem:[#allocation2] sm:$0xf] %vm1468_vm7, %v1457_v34 }
 0x8d4   : > { %v1600_v35 = vpop.xlane.xlu2 %1599 }
 0x8d5   : > { %2543 = vrcp.f32 %v1600_v35 }
 0x8db   : > { %v2544_v45 = vpop.eup %2543 }
 0x8dc   : > { %v1608_v36 = vmul.f32 %v2544_v45, %v2536_v16  ;;  %v1594_v29 = vpop.xlane.xlu2 %1593  ;;  %v2574_v16 = vld [vmem:[%s2951_s29 + $0x8] sm:$0xff]  ;;  %s2378_s29 = sshll.u32 %s2858_s17, 5  ;;  %s2118_s17 = scalar_lea.sflag [#allocation5], %s2933_s6 }
 0x8dd   : > { %2545 = vrcp.f32 %v1594_v29  ;;  %s2129_s22 = scalar_lea.hbm %s3430_s21, %s2378_s29 }
 0x8de   : > { %v1612_v38 = vpack.c.bf16 %v1608_v36, %v1608_v36  ;;  %s2132_s25 = sshll.u32 %s2129_s22, 4  ;;  %s2133_s25 = int_to_ptr.hbm [resolvable:$true] %s2132_s25 }
 0x8df   : > { %s2681_s28 = sshra.s32 %s2133_s25, 4  ;;  %s2682_s28 = int_to_ptr.hbm [resolvable:$true] %s2681_s28 }
 0x8e0   : > { %2292 = vmatmul.msk.bf16.vlgmr.msra.gmra.mxu1 %vm741_vm14, %v1612_v38  ;;  %s2683_s23 = scalar_lea.hbm %s2682_s28, 32  ;;  %p2688_p2 = scmp.lt.s32.totalorder %s2682_s28, %s3430_s21 }
 0x8e1   : > { %p2684_p1 = scmp.ne.s32.totalorder %s2682_s28, %s2683_s23  ;;  %p2689_p9 = scmp.lt.s32.totalorder %s2687_s14, %s2683_s23 }
 0x8e3   : > { %v2546_v19 = vpop.eup %2545  ;;  %p2685_p4 = pnand %p2684_p1, %p2903_p3  ;;  %p2690_p10 = por %p2689_p9, %p2688_p2 }
 0x8e4   : > { %v1606_v39 = vmul.f32 %v2546_v19, %v2538_v21  ;;  %v1597_v41 = vpop.xlane.xlu2 %1596 }
 0x8e5   : > { %2547 = vrcp.f32 %v1597_v41  ;;  %p2686_p11 = pneg %p2685_p4 }
 0x8e6   : > { %v1610_v42 = vpack.c.bf16 %v1606_v39, %v1606_v39 }
 0x8e7   : > { %p2691_p12 = pnand %p2690_p10, %p2686_p11 }
 0x8e8   : > { %2290 = vmatmul.msk.bf16.vlgmr.msrb.gmra.mxu3 %vm741_vm14, %v1610_v42 }
 0x8eb   : > { %v2548_v43 = vpop.eup %2547 }
 0x8ec   : > { %v1607_v4 = vmul.f32 %v2548_v43, %v2540_v24  ;;  %v1656_v46 = vpop.permute.xlu2 %1655 }
 0x8ed   : > { %v1661_v62 = vsel %vm886_vm4, %v1656_v46, 0 }
 0x8ee   : > { %v1611_v47 = vpack.c.bf16 %v1607_v4, %v1607_v4  ;;  %1670 = vmatpush.bf16.msrb.mxu0 %v1661_v62 }
 0x8f1   : > { %2291 = vmatmul.msk.bf16.vlgmr.msrb.gmra.mxu0 %vm741_vm14, %v1611_v47 }
 0x927   : > { %v1630_v48 = vpop.f32.mrf.mxu2 }
 0x928   : > { %v1697_v49 = vpack.c.bf16 %v1630_v48, %v1630_v48 }
 0x92a   : > { %1705 = vrot.lane.b32.xlu0 %v1697_v49, %s2760_s24 }
 0x92f   : > { %v1632_v37 = vpop.f32.mrf.mxu2 }
 0x932   : > { %1213 = vrot.lane.b32.xlu0 %v1202_v51, %s2758_s10  ;;  %v2369_v51 = vld [vmem:[#allocation8 + $0x8] sm:$0xff] }
 0x933   : > { %1923 = vmatpush.bf16.msra.mxu3 %v2369_v51  ;;  %v2377_v51 = vld [vmem:[%s3406_s12 + $0x38] sm:$0xff] }
 0x934   : > { %2090 = vmatpush.bf16.msra.mxu0 %v2377_v51 }
 0x95d   : > { %v1693_v52 = vpop.f32.mrf.mxu1 }
 0x95e   : > { %v1700_v23 = vpack.c.bf16 %v1693_v52, %v1693_v52 }
 0x965   : > { %v1695_v50 = vpop.f32.mrf.mxu1 }
 0x96b   : > { %v1651_v53 = vpop.f32.mrf.mxu3 }
 0x96c   : > { %v1698_v61 = vpack.c.bf16 %v1651_v53, %v1651_v53  ;;  %v2368_v53 = vld [vmem:[#allocation8] sm:$0xff] }
 0x96d   : > { %1924 = vmatpush.bf16.msra.mxu3 %v2368_v53  ;;  %v2373_v53 = vld [vmem:[%s3406_s12 + $0x18] sm:$0xff] }
 0x96e   : > { %v1672_v54 = vpop.f32.mrf.mxu0  ;;  %1707 = vrot.lane.b32.xlu2 %v1698_v61, %s2760_s24 }
 0x96f   : > { %v1699_v13 = vpack.c.bf16 %v1672_v54, %v1672_v54 }
 0x971   : > { %1709 = vrot.lane.b32.xlu0 %v1699_v13, %s2760_s24 }
 0x973   : > { %v1653_v55 = vpop.f32.mrf.mxu3 }
 0x976   : > { %v1674_v57 = vpop.f32.mrf.mxu0  ;;  %1460 = vrot.lane.b32.xlu2 %v1450_v56, %s2759_s20 }
 0x97e   : > { %1711 = vrot.lane.b32.xlu2 %v1700_v23, %s2760_s24 }
 0x99c   : > { %v1706_v9 = vpop.permute.xlu0 %1705 }
 0x99d   : > { %1718 = vst.msk [vmem:[#allocation2] sm:$0xf] %vm1717_vm8, %v1706_v9 }
 0x9a4   : > { %v1214_v58 = vpop.permute.xlu0 %1213 }
 0x9a5   : > { %1223 = vst.msk [vmem:[#allocation2 + $0xc] sm:$0xf] %vm1219_vm6, %v1214_v58 }
 0x9a6   : > { %1472 = vst.msk [vmem:[#allocation2 + $0xc] sm:$0xf] %vm1468_vm7, %v1463_v60 }
 0x9c8   : > { %v1708_v44 = vpop.permute.xlu2 %1707 }
 0x9c9   : > { %1719 = vst.msk [vmem:[#allocation2 + $0x4] sm:$0xf] %vm1717_vm8, %v1708_v44 }
 0x9d0   : > { %v1461_v10 = vpop.permute.xlu2 %1460  ;;  %v2364_v1 = vld [vmem:[#allocation2] sm:$0xff] }
 0x9d1   : > { %1471 = vst.msk [vmem:[#allocation2 + $0x8] sm:$0xf] %vm1468_vm7, %v1461_v10  ;;  %2309 = vmatmul.msk.bf16.vlgmr.msra.gmra.mxu2 %vm551_vm0, %v2364_v1 }
 0x9d8   : > { %v1712_v2 = vpop.permute.xlu2 %1711 }
 0x9d9   : > { %1721 = vst.msk [vmem:[#allocation2 + $0xc] sm:$0xf] %vm1717_vm8, %v1712_v2 }
 0x9e3   : > { %v1710_v3 = vpop.permute.xlu0 %1709 }
 0x9e4   : > { %1720 = vst.msk [vmem:[#allocation2 + $0x8] sm:$0xf] %vm1717_vm8, %v1710_v3  ;;  %v2471_v3 = vld [vmem:[%s3402_s8] ss:$0 sm:$0xff] }
 0x9eb   : > { %v2365_v5 = vld [vmem:[#allocation2 + $0x8] sm:$0xff] }
 0x9ec   : > { %2310 = vmatmul.msk.bf16.gmra.mxu2 %vm551_vm0, %v2365_v5 }
 0xa54   : > { %v1771_v40 = vpop.f32.mrf.mxu2 }
 0xa55   : > { %v1772_v7 = vadd.f32 %v2470_v6, %v1771_v40 }
 0xa57   : > { %v3264_v8 = vadd.f32 %v2573_v59, %v1772_v7 }
 0xa59   : > { %v1787_v11 = vsel %vm551_vm0, %v3264_v8, 0.0 }
 0xa5a   : > { %1788 = vadd.xlane.f32.xlu1 %v1787_v11 }
 0xa5c   : > { %v1773_v12 = vpop.f32.mrf.mxu2 }
 0xa5d   : > { %v1774_v15 = vadd.f32 %v2470_v6, %v1773_v12  ;;  %v2472_v12 = vld [vmem:[%s3403_s9] ss:$0 sm:$0xff] }
 0xa5f   : > { %v3269_v17 = vadd.f32 %v2574_v16, %v1774_v15 }
 0xa61   : > { %v1790_v18 = vsel %vm551_vm0, %v3269_v17, 0.0 }
 0xa62   : > { %1791 = vadd.xlane.f32.xlu0 %v1790_v18 }
 0xa6f   : > { %v1776_v20 = vpop.f32.mrf.mxu2 }
 0xa70   : > { %v1777_v21 = vadd.f32 %v2470_v6, %v1776_v20 }
 0xa72   : > { %v3274_v24 = vadd.f32 %v2575_v22, %v1777_v21 }
 0xa74   : > { %v1793_v25 = vsel %vm551_vm0, %v3274_v24, 0.0 }
 0xa75   : > { %1794 = vadd.xlane.f32.xlu2 %v1793_v25 }
 0xa77   : > { %v1778_v26 = vpop.f32.mrf.mxu2 }
 0xa78   : > { %v1779_v27 = vadd.f32 %v2470_v6, %v1778_v26 }
 0xa7a   : > { %v3279_v30 = vadd.f32 %v2576_v28, %v1779_v27 }
 0xa7c   : > { %v1796_v31 = vsel %vm551_vm0, %v3279_v30, 0.0 }
 0xa7d   : > { %1797 = vadd.xlane.f32.xlu1 %v1796_v31 }
 0xacd   : > { %v1789_v32 = vpop.xlane.xlu1 %1788 }
 0xace   : > { %v1799_v33 = vmul.f32 %v1789_v32, %v2961_v14 }
 0xad0   : > { %v1803_v34 = vsub.f32 %v3264_v8, %v1799_v33 }
 0xad2   : > { %v1807_v35 = vmul.f32 %v1803_v34, %v1803_v34 }
 0xad4   : > { %v1811_v45 = vsel %vm551_vm0, %v1807_v35, 0.0 }
 0xad5   : > { %1812 = vadd.xlane.f32.xlu0 %v1811_v45  ;;  %v1792_v36 = vpop.xlane.xlu0 %1791 }
 0xad6   : > { %v1800_v29 = vmul.f32 %v1792_v36, %v2961_v14 }
 0xad8   : > { %v1804_v38 = vsub.f32 %v3269_v17, %v1800_v29 }
 0xada   : > { %v1808_v19 = vmul.f32 %v1804_v38, %v1804_v38 }
 0xadc   : > { %v1814_v39 = vsel %vm551_vm0, %v1808_v19, 0.0 }
 0xadd   : > { %1815 = vadd.xlane.f32.xlu2 %v1814_v39 }
 0xae8   : > { %v1795_v41 = vpop.xlane.xlu2 %1794 }
 0xae9   : > { %v1801_v42 = vmul.f32 %v1795_v41, %v2961_v14 }
 0xaeb   : > { %v3291_v43 = vsub.f32 %v3274_v24, %v1801_v42 }
 0xaed   : > { %v1809_v4 = vmul.f32 %v3291_v43, %v3291_v43 }
 0xaef   : > { %v1817_v46 = vsel %vm551_vm0, %v1809_v4, 0.0 }
 0xaf0   : > { %v1798_v62 = vpop.xlane.xlu1 %1797  ;;  %1818 = vadd.xlane.f32.xlu1 %v1817_v46 }
 0xaf1   : > { %v1802_v47 = vmul.f32 %v1798_v62, %v2961_v14 }
 0xaf3   : > { %v3298_v48 = vsub.f32 %v3279_v30, %v1802_v47 }
 0xaf5   : > { %v1810_v49 = vmul.f32 %v3298_v48, %v3298_v48 }
 0xaf7   : > { %v1820_v37 = vsel %vm551_vm0, %v1810_v49, 0.0 }
 0xaf8   : > { %1821 = vadd.xlane.f32.xlu0 %v1820_v37 }
 0xb48   : > { %v1813_v52 = vpop.xlane.xlu0 %1812 }
 0xb49   : > { %v1823_v50 = vmul.f32 %v1813_v52, %v2961_v14  ;;  %v2374_v52 = vld [vmem:[%s3406_s12 + $0x20] sm:$0xff] }
 0xb4b   : > { %v1827_v61 = vadd.f32 1e-05, %v1823_v50  ;;  %v2473_v50 = vld [vmem:[%s3405_s11] ss:$0 sm:$0xff] }
 0xb4d   : > { %2549 = vrsqrt.f32 %v1827_v61  ;;  %vm1837_vm10 = vweird.f32 %v1827_v61 }
 0xb50   : > { %v1816_v54 = vpop.xlane.xlu2 %1815 }
 0xb51   : > { %v1824_v13 = vmul.f32 %v1816_v54, %v2961_v14 }
 0xb53   : > { %v2550_v55 = vpop.eup %2549  ;;  %v1828_v56 = vadd.f32 1e-05, %v1824_v13  ;;  %v2372_v13 = vld [vmem:[%s3406_s12 + $0x10] sm:$0xff] }
 0xb54   : > { %v1832_v57 = vmul.f32 %v2550_v55, %v1827_v61  ;;  %vm1838_vm9 = vweird.f32 %v2550_v55 }
 0xb55   : > { %2551 = vrsqrt.f32 %v1828_v56  ;;  %vm1839_vm11 = vmor %vm1837_vm10, %vm1838_vm9  ;;  %vm1847_vm13 = vweird.f32 %v1828_v56 }
 0xb56   : > { %v1833_v23 = vmul.f32 %v2550_v55, %v1832_v57  ;;  %v2371_v57 = vld [vmem:[%s3406_s12 + $0x8] sm:$0xff] }
 0xb58   : > { %v1834_v9 = vmul.f32 0.5, %v1833_v23 }
 0xb5a   : > { %v1835_v58 = vsub.f32 1.5, %v1834_v9 }
 0xb5b   : > { %v2552_v60 = vpop.eup %2551 }
 0xb5c   : > { %v1836_v63 = vmul.f32 %v2550_v55, %v1835_v58  ;;  %v1842_v0 = vmul.f32 %v2552_v60, %v1828_v56  ;;  %vm1848_vm12 = vweird.f32 %v2552_v60  ;;  %v2370_v58 = vld [vmem:[%s3406_s12] sm:$0xff] }
 0xb5d   : > { %vm1849_vm14 = vmor %vm1847_vm13, %vm1848_vm12 }
 0xb5e   : > { %v1843_v44 = vmul.f32 %v2552_v60, %v1842_v0  ;;  %v1840_v10 = vsel %vm1839_vm11, %v2550_v55, %v1836_v63 }
 0xb5f   : > { %v1871_v5 = vmul.f32 %v1840_v10, %v1803_v34 }
 0xb60   : > { %v1844_v1 = vmul.f32 0.5, %v1843_v44 }
 0xb61   : > { %v1878_v15 = vmul.f32 %v2471_v3, %v1871_v5 }
 0xb62   : > { %v1845_v2 = vsub.f32 1.5, %v1844_v1 }
 0xb63   : > { %v1819_v6 = vpop.xlane.xlu1 %1818  ;;  %v1885_v20 = vadd.f32 %v2472_v12, %v1878_v15 }
 0xb64   : > { %v1846_v40 = vmul.f32 %v2552_v60, %v1845_v2  ;;  %v1825_v7 = vmul.f32 %v1819_v6, %v2961_v14 }
 0xb66   : > { %v1850_v59 = vsel %vm1849_vm14, %v2552_v60, %v1846_v40  ;;  %v1829_v11 = vadd.f32 1e-05, %v1825_v7 }
 0xb67   : > { %v1872_v16 = vmul.f32 %v1850_v59, %v1804_v38 }
 0xb68   : > { %2553 = vrsqrt.f32 %v1829_v11  ;;  %vm1857_vm1 = vweird.f32 %v1829_v11 }
 0xb69   : > { %v1879_v18 = vmul.f32 %v2471_v3, %v1872_v16 }
 0xb6b   : > { %v1886_v21 = vadd.f32 %v2472_v12, %v1879_v18  ;;  %v1822_v22 = vpop.xlane.xlu0 %1821 }
 0xb6c   : > { %v1826_v25 = vmul.f32 %v1822_v22, %v2961_v14 }
 0xb6d   : > { %v1889_v26 = vpack.c.bf16 %v1886_v21, %v1885_v20 }
 0xb6e   : > { %v2554_v27 = vpop.eup %2553  ;;  %v1830_v28 = vadd.f32 1e-05, %v1826_v25 }
 0xb6f   : > { %v1852_v31 = vmul.f32 %v2554_v27, %v1829_v11  ;;  %2319 = vmatmul.msk.bf16.vlgmr.msra.gmra.mxu3 %vm551_vm0, %v1889_v26  ;;  %vm1858_vm15 = vweird.f32 %v2554_v27 }
 0xb70   : > { %2555 = vrsqrt.f32 %v1830_v28  ;;  %vm1859_vm2 = vmor %vm1857_vm1, %vm1858_vm15  ;;  %vm1867_vm4 = vweird.f32 %v1830_v28 }
 0xb71   : > { %v1853_v32 = vmul.f32 %v2554_v27, %v1852_v31 }
 0xb73   : > { %v1854_v33 = vmul.f32 0.5, %v1853_v32 }
 0xb75   : > { %v1855_v34 = vsub.f32 1.5, %v1854_v33 }
 0xb76   : > { %v2556_v35 = vpop.eup %2555 }
 0xb77   : > { %v1856_v45 = vmul.f32 %v2554_v27, %v1855_v34  ;;  %v1862_v36 = vmul.f32 %v2556_v35, %v1830_v28  ;;  %vm1868_vm3 = vweird.f32 %v2556_v35 }
 0xb78   : > { %vm1869_vm5 = vmor %vm1867_vm4, %vm1868_vm3 }
 0xb79   : > { %v1863_v29 = vmul.f32 %v2556_v35, %v1862_v36  ;;  %v1860_v38 = vsel %vm1859_vm2, %v2554_v27, %v1856_v45 }
 0xb7a   : > { %v1873_v39 = vmul.f32 %v1860_v38, %v3291_v43  ;;  %v2376_v43 = vld [vmem:[%s3406_s12 + $0x30] sm:$0xff] }
 0xb7b   : > { %v1864_v19 = vmul.f32 0.5, %v1863_v29  ;;  %2091 = vmatpush.bf16.msra.mxu0 %v2376_v43 }
 0xb7c   : > { %v1880_v46 = vmul.f32 %v2471_v3, %v1873_v39 }
 0xb7d   : > { %v1865_v14 = vsub.f32 1.5, %v1864_v19 }
 0xb7e   : > { %v1887_v47 = vadd.f32 %v2472_v12, %v1880_v46 }
 0xb7f   : > { %v1866_v41 = vmul.f32 %v2556_v35, %v1865_v14 }
 0xb81   : > { %v1870_v42 = vsel %vm1869_vm5, %v2556_v35, %v1866_v41 }
 0xb82   : > { %v1874_v4 = vmul.f32 %v1870_v42, %v3298_v48  ;;  %v2375_v48 = vld [vmem:[%s3406_s12 + $0x28] sm:$0xff] }
 0xb83   : > { %2092 = vmatpush.bf16.msra.mxu0 %v2375_v48 }
 0xb84   : > { %v1881_v62 = vmul.f32 %v2471_v3, %v1874_v4 }
 0xb86   : > { %v1888_v49 = vadd.f32 %v2472_v12, %v1881_v62 }
 0xb87   : > { %2093 = vmatpush.bf16.msra.mxu0 %v2374_v52 }
 0xb88   : > { %v1890_v37 = vpack.c.bf16 %v1888_v49, %v1887_v47 }
 0xb8a   : > { %2320 = vmatmul.msk.bf16.gmra.mxu3 %vm551_vm0, %v1890_v37 }
 0xb8b   : > { %2094 = vmatpush.bf16.msra.mxu0 %v2373_v53 }
 0xb8f   : > { %2095 = vmatpush.bf16.msra.mxu0 %v2372_v13 }
 0xb93   : > { %2096 = vmatpush.bf16.msra.mxu0 %v2371_v57 }
 0xb97   : > { %2097 = vmatpush.bf16.msra.mxu0 %v2370_v58 }
 0xbf2   : > { %v1926_v61 = vpop.f32.mrf.mxu3 }
 0xbf3   : > { %v1927_v54 = vadd.f32 %v2473_v50, %v1926_v61 }
 0xbf5   : > { %v2321_v55 = vmul.f32 -1.702, %v1927_v54 }
 0xbf7   : > { %v1944_v56 = vmul.f32 1.442695, %v2321_v55 }
 0xbf9   : > { %2557 = vpow2.f32 %v1944_v56 }
 0xbfa   : > { %v1928_v23 = vpop.f32.mrf.mxu3 }
 0xbfb   : > { %v1929_v9 = vadd.f32 %v2473_v50, %v1928_v23 }
 0xbfd   : > { %v2322_v60 = vmul.f32 -1.702, %v1929_v9 }
 0xbff   : > { %v2558_v63 = vpop.eup %2557  ;;  %v1946_v0 = vmul.f32 1.442695, %v2322_v60 }
 0xc00   : > { %v1952_v44 = vadd.f32 1.0, %v2558_v63 }
 0xc01   : > { %2559 = vpow2.f32 %v1946_v0 }
 0xc02   : > { %2561 = vrcp.f32 %v1952_v44  ;;  %v1967_v16 = vand.u32 2147483648, %v1952_v44  ;;  %vm1961_vm7 = vweird.f32 %v1952_v44  ;;  %v1965_v20 = vand.u32 2147483647, %v1952_v44 }
 0xc04   : > { %v1968_v31 = vor.u32 1.1754944e-38, %v1967_v16  ;;  %vm1966_vm10 = vcmp.eq.f32.partialorder %v1965_v20, 8.507059e+37 }
 0xc07   : > { %v2560_v10 = vpop.eup %2559 }
 0xc08   : > { %v2562_v1 = vpop.eup %2561  ;;  %v1953_v2 = vadd.f32 1.0, %v2560_v10  ;;  %v2474_v10 = vld [vmem:[%s3407_s13] ss:$0 sm:$0xff] }
 0xc09   : > { %v1957_v3 = vmul.f32 %v2562_v1, %v1952_v44  ;;  %vm1962_vm6 = vweird.f32 %v2562_v1 }
 0xc0a   : > { %2563 = vrcp.f32 %v1953_v2  ;;  %vm1963_vm8 = vmor %vm1961_vm7, %vm1962_vm6  ;;  %v1982_v22 = vand.u32 2147483648, %v1953_v2  ;;  %v1980_v27 = vand.u32 2147483647, %v1953_v2  ;;  %vm1976_vm11 = vweird.f32 %v1953_v2 }
 0xc0b   : > { %v1958_v5 = vsub.f32 1.0, %v1957_v3 }
 0xc0c   : > { %v1983_v35 = vor.u32 1.1754944e-38, %v1982_v22  ;;  %vm1981_vm13 = vcmp.eq.f32.partialorder %v1980_v27, 8.507059e+37 }
 0xc0d   : > { %v1959_v6 = vmul.f32 %v2562_v1, %v1958_v5  ;;  %v1931_v40 = vpop.f32.mrf.mxu3 }
 0xc0e   : > { %v3344_v7 = vadd.f32 %v2473_v50, %v1931_v40 }
 0xc0f   : > { %v1960_v12 = vadd.f32 %v2562_v1, %v1959_v6 }
 0xc10   : > { %v2564_v59 = vpop.eup %2563  ;;  %v2323_v11 = vmul.f32 -1.702, %v3344_v7 }
 0xc11   : > { %v1972_v15 = vmul.f32 %v2564_v59, %v1953_v2  ;;  %v1964_v25 = vsel %vm1963_vm8, %v2562_v1, %v1960_v12  ;;  %vm1977_vm9 = vweird.f32 %v2564_v59 }
 0xc12   : > { %v1948_v18 = vmul.f32 1.442695, %v2323_v11  ;;  %v1969_v34 = vsel %vm1966_vm10, %v1968_v31, %v1964_v25  ;;  %vm1978_vm12 = vmor %vm1976_vm11, %vm1977_vm9 }
 0xc13   : > { %v1973_v21 = vsub.f32 1.0, %v1972_v15  ;;  %v2016_v14 = vmul.f32 %v1969_v34, %v1927_v54 }
 0xc14   : > { %2565 = vpow2.f32 %v1948_v18 }
 0xc15   : > { %v1974_v26 = vmul.f32 %v2564_v59, %v1973_v21  ;;  %v1933_v28 = vpop.f32.mrf.mxu3 }
 0xc16   : > { %v1934_v32 = vadd.f32 %v2473_v50, %v1933_v28 }
 0xc17   : > { %v1975_v33 = vadd.f32 %v2564_v59, %v1974_v26 }
 0xc18   : > { %v2324_v45 = vmul.f32 -1.702, %v1934_v32 }
 0xc19   : > { %v1979_v36 = vsel %vm1978_vm12, %v2564_v59, %v1975_v33 }
 0xc1a   : > { %v2566_v29 = vpop.eup %2565  ;;  %v1984_v38 = vsel %vm1981_vm13, %v1983_v35, %v1979_v36  ;;  %v1950_v19 = vmul.f32 1.442695, %v2324_v45 }
 0xc1b   : > { %v2017_v39 = vmul.f32 %v1984_v38, %v1929_v9  ;;  %v1954_v41 = vadd.f32 1.0, %v2566_v29 }
 0xc1c   : > { %2567 = vpow2.f32 %v1950_v19 }
 0xc1d   : > { %v2020_v42 = vpack.c.bf16 %v2017_v39, %v2016_v14  ;;  %2569 = vrcp.f32 %v1954_v41  ;;  %v1997_v52 = vand.u32 2147483648, %v1954_v41  ;;  %vm1991_vm15 = vweird.f32 %v1954_v41 }
 0xc1e   : > { %v1995_v50 = vand.u32 2147483647, %v1954_v41 }
 0xc1f   : > { %2098 = vmatmul.bf16.vlgmr.msra.gmra.mxu0 %v2020_v42  ;;  %v1998_v56 = vor.u32 1.1754944e-38, %v1997_v52 }
 0xc20   : > { %vm1996_vm3 = vcmp.eq.f32.partialorder %v1995_v50, 8.507059e+37 }
 0xc22   : > { %v2568_v4 = vpop.eup %2567 }
 0xc23   : > { %v2570_v46 = vpop.eup %2569  ;;  %v1955_v62 = vadd.f32 1.0, %v2568_v4 }
 0xc24   : > { %v1987_v47 = vmul.f32 %v2570_v46, %v1954_v41  ;;  %vm1992_vm14 = vweird.f32 %v2570_v46 }
 0xc25   : > { %2571 = vrcp.f32 %v1955_v62  ;;  %vm1993_vm1 = vmor %vm1991_vm15, %vm1992_vm14  ;;  %v2012_v61 = vand.u32 2147483648, %v1955_v62  ;;  %v2010_v55 = vand.u32 2147483647, %v1955_v62  ;;  %vm2006_vm4 = vweird.f32 %v1955_v62 }
 0xc26   : > { %v1988_v49 = vsub.f32 1.0, %v1987_v47 }
 0xc27   : > { %v2013_v9 = vor.u32 1.1754944e-38, %v2012_v61  ;;  %vm2011_vm6 = vcmp.eq.f32.partialorder %v2010_v55, 8.507059e+37 }
 0xc28   : > { %v1989_v37 = vmul.f32 %v2570_v46, %v1988_v49 }
 0xc2a   : > { %v1990_v43 = vadd.f32 %v2570_v46, %v1989_v37 }
 0xc2b   : > { %v2572_v51 = vpop.eup %2571 }
 0xc2c   : > { %v2002_v48 = vmul.f32 %v2572_v51, %v1955_v62  ;;  %v1994_v54 = vsel %vm1993_vm1, %v2570_v46, %v1990_v43  ;;  %vm2007_vm2 = vweird.f32 %v2572_v51 }
 0xc2d   : > { %v1999_v23 = vsel %vm1996_vm3, %v1998_v56, %v1994_v54  ;;  %vm2008_vm5 = vmor %vm2006_vm4, %vm2007_vm2 }
 0xc2e   : > { %v2003_v53 = vsub.f32 1.0, %v2002_v48  ;;  %v2018_v63 = vmul.f32 %v1999_v23, %v3344_v7 }
 0xc30   : > { %v2004_v13 = vmul.f32 %v2572_v51, %v2003_v53 }
 0xc32   : > { %v2005_v57 = vadd.f32 %v2572_v51, %v2004_v13 }
 0xc34   : > { %v2009_v58 = vsel %vm2008_vm5, %v2572_v51, %v2005_v57 }
 0xc35   : > { %v2014_v60 = vsel %vm2011_vm6, %v2013_v9, %v2009_v58 }
 0xc36   : > { %v2019_v0 = vmul.f32 %v2014_v60, %v1934_v32 }
 0xc38   : > { %v2021_v44 = vpack.c.bf16 %v2019_v0, %v2018_v63 }
 0xc3a   : > { %2103 = vmatmul.bf16.gmra.mxu0 %v2021_v44 }
 0xc9c   : > { %v2099_v1 = vpop.f32.mrf.mxu0 }
 0xc9d   : > { %v2100_v2 = vadd.f32 %v2474_v10, %v2099_v1 }
 0xc9f   : > { %v2109_v3 = vadd.f32 %v2100_v2, %v3264_v8 }
 0xca1   : > { %2113 = vst.msk [vmem:[%s535_s19] sm:$0xff] %vm551_vm0, %v2109_v3 }
 0xca4   : > { %v2101_v5 = vpop.f32.mrf.mxu0 }
 0xca5   : > { %v2102_v6 = vadd.f32 %v2474_v10, %v2101_v5 }
 0xca7   : > { %v2110_v40 = vadd.f32 %v2102_v6, %v3269_v17 }
 0xca9   : > { %2114 = vst.msk [vmem:[%s535_s19 + $0x8] sm:$0xff] %vm551_vm0, %v2110_v40 }
 0xcb7   : > { %v2104_v7 = vpop.f32.mrf.mxu0 }
 0xcb8   : > { %v2105_v59 = vadd.f32 %v2474_v10, %v2104_v7 }
 0xcba   : > { %v2111_v11 = vadd.f32 %v2105_v59, %v3274_v24 }
 0xcbc   : > { %2115 = vst.msk [vmem:[%s535_s19 + $0x10] sm:$0xff] %vm551_vm0, %v2111_v11 }
 0xcbf   : > { %v2106_v8 = vpop.f32.mrf.mxu0 }
 0xcc0   : > { %v2107_v12 = vadd.f32 %v2474_v10, %v2106_v8 }
 0xcc2   : > { %v2112_v17 = vadd.f32 %v2107_v12, %v3279_v30 }
 0xcc4   : > { %2116 = vst.msk [vmem:[%s535_s19 + $0x18] sm:$0xff] %vm551_vm0, %v2112_v17 }
 0xcc5   : > { %2694 = shalt.err (!%p2691_p12)
}
 0xcc6   : > { %s2761_s6 = smov 128  }
 0xcc7   : > { %2389 = dma.vmem_to_hbm [thread:$0]  (%p2903_p3), %s2131_s26, 512, %s2133_s25, %s2118_s17, %s2761_s6, %s2761_s6, %s2758_s10  }
 0xcc8 PF: > { %s3431_s19 = sld [smem:[#allocation13_spill]]  ;;  %p3433_p13 = scmp.ge.s32.totalorder %s2737_s16, 2 }
 0xcca   : > { %p2403_p0 = pnand %p3433_p13, %p2872_p6 }
 0xccc   : > { %p2404_p5 = pneg %p2403_p0 }
 0xcce   : > { %s2147_s22 = sand.u32 1, %s3431_s19  }
 0xccf   : > { %s2148_s20 = scalar_lea.sflag [#allocation5], %s2147_s22 }
 0xcd0   : > { %2720 = dma.done.wait (%p2404_p5), %s2148_s20, 512  }
 0xcd1   : > { %2722 = vsyncadd (%p2404_p5), %s2148_s20, 4294966784  ;;  %s3434_s16 = sld [smem:[#allocation16_spill]]  ;;  %s3437_s29 = smov %s2729_s30 }
 0xcd2   : > { %s3435_s28 = sld [smem:[#allocation14_spill]] }
 0xcd3   : > { %s3436_s15 = sld [smem:[#allocation17_spill]] }
 0xcd7   : > { %p28_p7 = scmp.ge.s32.totalorder %s3434_s16, 4  }
 0xcd8   : > { %s3438_s30 = smov %s3435_s28 }
 0xcd9   :  { %30 = sbr.rel (!%p28_p7) target bundleno = 10 (0xa), region = 132 }
 0xcde   :  { %2154 = vsyncpa [#allocation4], 1 }
 0xcdf   :  { %2156 = vsyncpa [#allocation4 + $0x1], 1 }
 0xce0   :  { %2157 = vsyncpa [#allocation7], 1 }
 0xce1   :  { %2158 = vsyncpa [#allocation5], 1 }
 0xce2   :  { %2160 = vsyncpa [#allocation5 + $0x1], 1 }

</bundles_post_ra>
